<compile_context>
chip_gen: v5e
topology: v5e:2x2
jax: 0.10.0
libtpu: 0.0.40
codegen_flags: <defaults>
</compile_context>

<pallas_src>
import math

import jax
import jax.numpy as jnp
from jax import lax
from jax.experimental import pallas as pl
from jax.experimental.pallas import tpu as pltpu

# ----------------------------- model config ---------------------------------
VOCAB = 256          # vocab_size (small, lane-aligned)
D = 128              # hidden_dim
E = 3                # num_experts
EP = 128             # padded router/gate lane width
H2 = 2 * D           # expert hidden width per expert
EH = E * H2          # fused expert hidden width (768)
W_UP = EP + EH       # fused [router | expert-up] width (896)
W_DN = EH + EP       # fused [expert-down ; expert-bias] contraction (896)
TOPK = 2
TM_MAX = 512         # token tile (sublane multiple of 8)
LN_EPS = 1e-5


def _round_up(x, m):
    return (x + m - 1) // m * m


# ------------------------------ Pallas kernel --------------------------------
def _mgm_kernel(flat_ref, wup_ref, bup_ref, gexp_ref, w2e_ref,
                gamma_ref, beta_ref, wp_ref, bp_ref,
                logits_ref, weights_ref):
    x = flat_ref[...]                                              # (TM, D) bf16

    # ---- ONE fused matmul for router logits + expert up-projection ---------
    up = jnp.dot(x, wup_ref[...], preferred_element_type=jnp.float32) + bup_ref[...]
    r = up[:, :EP]                                                 # (TM, EP) router logits (lane-aligned slice)
    h = up[:, EP:]                                                 # (TM, EH) expert hidden pre-activation

    # ---- tie-safe top-2-of-E softmax gating ---------------------------------
    col = lax.broadcasted_iota(jnp.int32, r.shape, 1)              # (TM, EP)
    valid = col < E
    big = jnp.float32(1e30)
    r_valid = jnp.where(valid, r, big)
    rmin = jnp.min(r_valid, axis=-1, keepdims=True)
    # drop exactly one expert: the argmin (ties broken toward the largest
    # index, so kept experts tie-break toward lower indices). Guarantees 2 kept.
    is_min = valid & (r_valid == rmin)
    drop = jnp.max(jnp.where(is_min, col, -1), axis=-1, keepdims=True)
    keep = valid & (col != drop)
    masked = jnp.where(keep, r, -big)
    m = jnp.max(masked, axis=-1, keepdims=True)
    ex = jnp.exp(masked - m)                                        # non-kept -> 0
    denom = jnp.sum(ex, axis=-1, keepdims=True)                     # >= 1 always
    w = ex / denom                                                  # exact softmax weights
    w_bf = w.astype(jnp.bfloat16)
    weights_ref[...] = w_bf                                         # (TM, EP) bf16, cols >= E are 0

    # ---- gate expansion on the MXU: (TM,EP) x (EP,EH) -> per-lane gate ------
    gate = jnp.dot(w_bf, gexp_ref[...], preferred_element_type=jnp.float32)

    # ---- GELU + gate-scale, back to bf16 for the down-projection ------------
    h = jax.nn.gelu(h, approximate=True)                            # (TM, EH) f32
    hg = (h * gate).astype(jnp.bfloat16)

    # ---- fused down-projection + gated expert biases ------------------------
    # [hg | w] (TM, EH+EP) x [[W2_stacked]; [b2_padded]] (EH+EP, D)
    hg_ext = jnp.concatenate([hg, w_bf], axis=1)                     # (TM, W_DN)
    comb = jnp.dot(hg_ext, w2e_ref[...], preferred_element_type=jnp.float32)

    # ---- LayerNorm -----------------------------------------------------------
    mean = jnp.mean(comb, axis=-1, keepdims=True)
    c = comb - mean
    var = jnp.mean(c * c, axis=-1, keepdims=True)
    normed = c * lax.rsqrt(var + LN_EPS) * gamma_ref[...] + beta_ref[...]

    # ---- output projection D -> V --------------------------------------------
    logits_ref[...] = (jnp.dot(normed.astype(jnp.bfloat16), wp_ref[...],
                               preferred_element_type=jnp.float32) + bp_ref[...])


def _fused_forward(flat, params, tm):
    """flat: (N, D) bf16 token hidden states, N a multiple of tm.
    Returns (logits (N, VOCAB) f32, gate weights (N, EP) bf16)."""
    n = flat.shape[0]
    assert n % tm == 0
    grid = (n // tm,)

    # Weights use full-block specs with a constant block index, so their DMA is
    # issued once and effectively resident in VMEM across grid steps.
    full = lambda shape: pl.BlockSpec(shape, lambda i: (0,) * len(shape))
    in_specs = [
        pl.BlockSpec((tm, D), lambda i: (i, 0)),   # flat tokens (bf16)
        full((D, W_UP)),                            # fused [router | up] W (bf16)
        full((1, W_UP)),                            # fused [router | up] bias (f32)
        full((EP, EH)),                             # gate-expansion slab mask (bf16)
        full((W_DN, D)),                            # fused [down ; b2] W (bf16)
        full((1, D)),                               # LN gamma
        full((1, D)),                               # LN beta
        full((D, VOCAB)),                           # proj W (bf16)
        full((1, VOCAB)),                           # proj b (f32)
    ]
    out_specs = [
        pl.BlockSpec((tm, VOCAB), lambda i: (i, 0)),
        pl.BlockSpec((tm, EP), lambda i: (i, 0)),
    ]
    out_shape = (
        jax.ShapeDtypeStruct((n, VOCAB), jnp.float32),
        jax.ShapeDtypeStruct((n, EP), jnp.bfloat16),
    )

    weight_bytes = (D * W_UP + EP * EH + W_DN * D + D * VOCAB) * 2 \
        + (W_UP + VOCAB + 2 * D) * 4
    cost = pl.CostEstimate(
        flops=2 * n * (D * W_UP + EP * EH + W_DN * D + D * VOCAB),
        transcendentals=n * (EH + EP),
        bytes_accessed=n * D * 2 + n * VOCAB * 4 + n * EP * 2 + weight_bytes,
    )

    return pl.pallas_call(
        _mgm_kernel,
        out_shape=out_shape,
        grid_spec=pltpu.PrefetchScalarGridSpec(
            num_scalar_prefetch=0,
            grid=grid,
            in_specs=in_specs,
            out_specs=out_specs,
        ),
        compiler_params=pltpu.CompilerParams(
            dimension_semantics=("parallel",),
            vmem_limit_bytes=32 * 1024 * 1024),
        cost_estimate=cost,
    )(flat, params["w_up"], params["b_up"], params["g_exp"], params["w2e"],
      params["gamma"], params["beta"], params["wp"], params["bp"])


# ----------------------------- python wrapper --------------------------------
def init_params(key):
    ks = jax.random.split(key, 12)
    p = {}
    # bf16 tables: the embedding gather emits bf16 directly (no f32 HBM pass)
    p["embedding"] = jax.random.normal(ks[0], (VOCAB, D), jnp.float32).astype(jnp.bfloat16)
    p["position"] = jax.random.normal(ks[1], (512, D), jnp.float32).astype(jnp.bfloat16)

    # router (linear D -> E), padded along lanes to EP
    wr = jax.random.normal(ks[2], (D, E), jnp.float32) / math.sqrt(D)
    br = jax.random.normal(ks[3], (E,), jnp.float32) * 0.01
    wr_pad = jnp.zeros((D, EP), jnp.float32).at[:, :E].set(wr)
    br_pad = jnp.zeros((1, EP), jnp.float32).at[0, :E].set(br)

    # experts: Linear(D, 2D) -> GELU -> Linear(2D, D), stacked layouts
    w1 = jax.random.normal(ks[4], (E, D, H2), jnp.float32) / math.sqrt(D)
    b1 = jax.random.normal(ks[5], (E, H2), jnp.float32) * 0.01
    w2 = jax.random.normal(ks[6], (E, H2, D), jnp.float32) / math.sqrt(H2)
    b2 = jax.random.normal(ks[7], (E, D), jnp.float32) * 0.01
    w1s = jnp.concatenate([w1[e] for e in range(E)], axis=1)        # (D, EH)
    b1s = jnp.concatenate([b1[e] for e in range(E)], axis=0).reshape(1, EH)
    w2s = jnp.concatenate([w2[e] for e in range(E)], axis=0)        # (EH, D)
    b2m = jnp.zeros((EP, D), jnp.float32).at[:E, :].set(b2)         # (EP, D)

    # fused [router | expert-up] weight & bias
    p["w_up"] = jnp.concatenate([wr_pad, w1s], axis=1).astype(jnp.bfloat16)   # (D, 896)
    p["b_up"] = jnp.concatenate([br_pad, b1s], axis=1)                        # (1, 896) f32

    # gate-expansion matrix: row e has ones across expert e's 2D-wide slab
    g = jnp.zeros((EP, EH), jnp.float32)
    for e in range(E):
        g = g.at[e, e * H2:(e + 1) * H2].set(1.0)
    p["g_exp"] = g.astype(jnp.bfloat16)

    # fused [expert-down ; gated expert-bias] weight
    p["w2e"] = jnp.concatenate([w2s, b2m], axis=0).astype(jnp.bfloat16)       # (896, 128)

    # LayerNorm + output projection
    p["gamma"] = jnp.ones((1, D), jnp.float32)
    p["beta"] = jnp.zeros((1, D), jnp.float32)
    p["wp"] = (jax.random.normal(ks[8], (D, VOCAB), jnp.float32) / math.sqrt(D)).astype(jnp.bfloat16)
    p["bp"] = jax.random.normal(ks[9], (1, VOCAB), jnp.float32) * 0.01
    return p


@jax.jit
def concept_aware_mgm_forward(input_ids, params):
    bsz, seq = input_ids.shape
    n = bsz * seq
    # embedding lookup + learned positions (bf16 gather/broadcast glue)
    hidden = params["embedding"][input_ids] + params["position"][:seq][None, :, :]
    flat = hidden.reshape(-1, D)                                    # (N, D) bf16

    # token tile: big for throughput, shrunk + padded for tiny inputs;
    # keep >= 2 grid steps when possible so v7x megacore can shard the axis.
    tm = max(8, min(TM_MAX, _round_up(n, 8)))
    if _round_up(n, tm) // tm < 2 and n > 8:
        tm = min(tm, max(8, _round_up((n + 1) // 2, 8)))
    n_pad = _round_up(n, tm)
    if n_pad != n:
        flat = jnp.pad(flat, ((0, n_pad - n), (0, 0)))

    logits_flat, w_pad = _fused_forward(flat, params, tm)
    logits_flat = logits_flat[:n]
    weights = w_pad[:n, :E].astype(jnp.float32)                     # (N, E) top-2 gate weights

    # switch-style balance loss + routing analysis (scalar aux, plain JAX glue)
    importance = weights.mean(axis=0)
    load = (weights > 0).astype(jnp.float32).mean(axis=0)
    bal_loss = jnp.float32(E) * jnp.sum(importance * load)
    entropy = -jnp.sum(jnp.where(weights > 0,
                                 weights * jnp.log(weights + 1e-9), 0.0), axis=-1)
    analysis = {
        "avg_sophistication": entropy.mean(),
        "expert_usage": load,
    }

    logits = logits_flat.reshape(bsz, seq, VOCAB)
    return {"logits": logits, "balance_loss": bal_loss, "routing_analysis": analysis}


# ---------------------------------- main -------------------------------------
if __name__ == "__main__":
    key = jax.random.PRNGKey(0)
    pkey, ikey = jax.random.split(key)
    params = init_params(pkey)

    bsz, seq = 2, 8
    input_ids = jax.random.randint(ikey, (bsz, seq), 0, VOCAB, dtype=jnp.int32)

    out = concept_aware_mgm_forward(input_ids, params)
    jax.block_until_ready(out)

    assert out["logits"].shape == (bsz, seq, VOCAB)
    assert out["balance_loss"].shape == ()
    assert jnp.isfinite(out["logits"]).all()
    assert jnp.isfinite(out["balance_loss"])
    assert jnp.isfinite(out["routing_analysis"]["avg_sophistication"])
    print("KERNEL_OK")
</pallas_src>

<mosaic_0001>
module attributes {stable_mosaic.version = 11 : i64} {
  func.func @_mgm_kernel(%arg0: i32, %arg1: memref<8x128xbf16, #tpu.memory_space<vmem>>, %arg2: memref<128x896xbf16, #tpu.memory_space<vmem>>, %arg3: memref<1x896xf32, #tpu.memory_space<vmem>>, %arg4: memref<128x768xbf16, #tpu.memory_space<vmem>>, %arg5: memref<896x128xbf16, #tpu.memory_space<vmem>>, %arg6: memref<1x128xf32, #tpu.memory_space<vmem>>, %arg7: memref<1x128xf32, #tpu.memory_space<vmem>>, %arg8: memref<128x256xbf16, #tpu.memory_space<vmem>>, %arg9: memref<1x256xf32, #tpu.memory_space<vmem>>, %arg10: memref<8x256xf32, #tpu.memory_space<vmem>>, %arg11: memref<8x128xbf16, #tpu.memory_space<vmem>>) attributes {dimension_semantics = [#tpu.dimension_semantics<parallel>], iteration_bounds = array<i64: 2>, scalar_prefetch = 0 : i64, scratch_operands = 0 : i64, tpu.core_type = #tpu.core_type<tc>, window_params = [{transform_indices = @transform_0, window_bounds = array<i64: 8, 128>}, {pipeline_mode = #tpu.pipeline_mode<synchronous>, transform_indices = @transform_1, window_bounds = array<i64: 128, 896>}, {pipeline_mode = #tpu.pipeline_mode<synchronous>, transform_indices = @transform_2, window_bounds = array<i64: 1, 896>}, {pipeline_mode = #tpu.pipeline_mode<synchronous>, transform_indices = @transform_3, window_bounds = array<i64: 128, 768>}, {pipeline_mode = #tpu.pipeline_mode<synchronous>, transform_indices = @transform_4, window_bounds = array<i64: 896, 128>}, {pipeline_mode = #tpu.pipeline_mode<synchronous>, transform_indices = @transform_5, window_bounds = array<i64: 1, 128>}, {pipeline_mode = #tpu.pipeline_mode<synchronous>, transform_indices = @transform_6, window_bounds = array<i64: 1, 128>}, {pipeline_mode = #tpu.pipeline_mode<synchronous>, transform_indices = @transform_7, window_bounds = array<i64: 128, 256>}, {pipeline_mode = #tpu.pipeline_mode<synchronous>, transform_indices = @transform_8, window_bounds = array<i64: 1, 256>}, {transform_indices = @transform_9, window_bounds = array<i64: 8, 256>}, {transform_indices = @transform_10, window_bounds = array<i64: 8, 128>}]} {
    %c0 = arith.constant 0 : index
    %c0_0 = arith.constant 0 : index
    %0 = vector.load %arg1[%c0, %c0_0] : memref<8x128xbf16, #tpu.memory_space<vmem>>, vector<8x128xbf16>
    %c0_1 = arith.constant 0 : index
    %c0_2 = arith.constant 0 : index
    %1 = vector.load %arg2[%c0_1, %c0_2] : memref<128x896xbf16, #tpu.memory_space<vmem>>, vector<128x896xbf16>
    %cst = arith.constant dense<0.000000e+00> : vector<8x896xf32>
    %2 = tpu.matmul %0, %1, %cst {dimension_numbers = #tpu.dot_dimension_numbers<[1], [0], [0], [1], [0, 0, 1, 1], [], []>} : vector<8x128xbf16>, vector<128x896xbf16>, vector<8x896xf32> -> vector<8x896xf32>
    %c0_3 = arith.constant 0 : index
    %c0_4 = arith.constant 0 : index
    %3 = vector.load %arg3[%c0_3, %c0_4] : memref<1x896xf32, #tpu.memory_space<vmem>>, vector<1x896xf32>
    %4 = vector.broadcast %3 : vector<1x896xf32> to vector<8x896xf32>
    %5 = arith.addf %2, %4 : vector<8x896xf32>
    %6 = vector.extract_strided_slice %5 {offsets = [0, 0], sizes = [8, 128], strides = [1, 1]} : vector<8x896xf32> to vector<8x128xf32>
    %7 = vector.extract_strided_slice %5 {offsets = [0, 128], sizes = [8, 768], strides = [1, 1]} : vector<8x896xf32> to vector<8x768xf32>
    %8 = tpu.iota {dimensions = array<i32: 1>} : vector<8x128xi32>
    %c3_i32 = arith.constant 3 : i32
    %9 = vector.broadcast %c3_i32 : i32 to vector<8x128xi32>
    %10 = arith.cmpi slt, %8, %9 : vector<8x128xi32>
    %cst_5 = arith.constant 1.000000e+30 : f32
    %11 = vector.broadcast %cst_5 : f32 to vector<8x128xf32>
    %12 = arith.select %10, %6, %11 : vector<8x128xi1>, vector<8x128xf32>
    %cst_6 = arith.constant dense<0x7F800000> : vector<8xf32>
    %13 = vector.multi_reduction <minimumf>, %12, %cst_6 [1] : vector<8x128xf32> to vector<8xf32>
    %14 = vector.shape_cast %13 : vector<8xf32> to vector<8x1xf32>
    %15 = vector.broadcast %14 : vector<8x1xf32> to vector<8x128xf32>
    %16 = arith.cmpf oeq, %12, %15 : vector<8x128xf32>
    %17 = arith.andi %10, %16 : vector<8x128xi1>
    %c-1_i32 = arith.constant -1 : i32
    %18 = vector.broadcast %c-1_i32 : i32 to vector<8x128xi32>
    %19 = arith.select %17, %8, %18 : vector<8x128xi1>, vector<8x128xi32>
    %cst_7 = arith.constant dense<-2147483648> : vector<8xi32>
    %20 = vector.multi_reduction <maxsi>, %19, %cst_7 [1] : vector<8x128xi32> to vector<8xi32>
    %21 = vector.shape_cast %20 : vector<8xi32> to vector<8x1xi32>
    %22 = vector.broadcast %21 : vector<8x1xi32> to vector<8x128xi32>
    %23 = arith.cmpi ne, %8, %22 : vector<8x128xi32>
    %24 = arith.andi %10, %23 : vector<8x128xi1>
    %cst_8 = arith.constant 0.000000e+00 : f32
    %cst_9 = arith.constant 1.000000e+30 : f32
    %25 = arith.subf %cst_8, %cst_9 : f32
    %26 = vector.broadcast %25 : f32 to vector<8x128xf32>
    %27 = arith.select %24, %6, %26 : vector<8x128xi1>, vector<8x128xf32>
    %cst_10 = arith.constant dense<0xFF800000> : vector<8xf32>
    %28 = vector.multi_reduction <maximumf>, %27, %cst_10 [1] : vector<8x128xf32> to vector<8xf32>
    %29 = vector.shape_cast %28 : vector<8xf32> to vector<8x1xf32>
    %30 = vector.broadcast %29 : vector<8x1xf32> to vector<8x128xf32>
    %31 = arith.subf %27, %30 : vector<8x128xf32>
    %32 = math.exp %31 : vector<8x128xf32>
    %cst_11 = arith.constant dense<0.000000e+00> : vector<8xf32>
    %33 = vector.multi_reduction <add>, %32, %cst_11 [1] : vector<8x128xf32> to vector<8xf32>
    %34 = vector.shape_cast %33 : vector<8xf32> to vector<8x1xf32>
    %35 = vector.broadcast %34 : vector<8x1xf32> to vector<8x128xf32>
    %36 = arith.divf %32, %35 : vector<8x128xf32>
    %37 = arith.truncf %36 : vector<8x128xf32> to vector<8x128xbf16>
    %c0_12 = arith.constant 0 : index
    %c0_13 = arith.constant 0 : index
    %38 = vector.load %arg11[%c0_12, %c0_13] : memref<8x128xbf16, #tpu.memory_space<vmem>>, vector<8x128xbf16>
    tpu.vector_store %arg11[%c0_12, %c0_13], %37 {strides = array<i32>} : memref<8x128xbf16, #tpu.memory_space<vmem>>, vector<8x128xbf16>,
    %c0_14 = arith.constant 0 : index
    %c0_15 = arith.constant 0 : index
    %39 = vector.load %arg4[%c0_14, %c0_15] : memref<128x768xbf16, #tpu.memory_space<vmem>>, vector<128x768xbf16>
    %cst_16 = arith.constant dense<0.000000e+00> : vector<8x768xf32>
    %40 = tpu.matmul %37, %39, %cst_16 {dimension_numbers = #tpu.dot_dimension_numbers<[1], [0], [0], [1], [0, 0, 1, 1], [], []>} : vector<8x128xbf16>, vector<128x768xbf16>, vector<8x768xf32> -> vector<8x768xf32>
    %41 = arith.mulf %7, %7 : vector<8x768xf32>
    %42 = arith.mulf %7, %41 : vector<8x768xf32>
    %cst_17 = arith.constant 4.471500e-02 : f32
    %43 = vector.broadcast %cst_17 : f32 to vector<8x768xf32>
    %44 = arith.mulf %43, %42 : vector<8x768xf32>
    %45 = arith.addf %7, %44 : vector<8x768xf32>
    %cst_18 = arith.constant 0.797884583 : f32
    %46 = vector.broadcast %cst_18 : f32 to vector<8x768xf32>
    %47 = arith.mulf %46, %45 : vector<8x768xf32>
    %48 = math.tanh %47 : vector<8x768xf32>
    %cst_19 = arith.constant 1.000000e+00 : f32
    %49 = vector.broadcast %cst_19 : f32 to vector<8x768xf32>
    %50 = arith.addf %49, %48 : vector<8x768xf32>
    %cst_20 = arith.constant 5.000000e-01 : f32
    %51 = vector.broadcast %cst_20 : f32 to vector<8x768xf32>
    %52 = arith.mulf %51, %50 : vector<8x768xf32>
    %53 = arith.mulf %7, %52 : vector<8x768xf32>
    %54 = arith.mulf %53, %40 : vector<8x768xf32>
    %55 = arith.truncf %54 : vector<8x768xf32> to vector<8x768xbf16>
    %56 = tpu.concatenate %55, %37 in 1 : vector<8x768xbf16>, vector<8x128xbf16> -> vector<8x896xbf16>
    %c0_21 = arith.constant 0 : index
    %c0_22 = arith.constant 0 : index
    %57 = vector.load %arg5[%c0_21, %c0_22] : memref<896x128xbf16, #tpu.memory_space<vmem>>, vector<896x128xbf16>
    %cst_23 = arith.constant dense<0.000000e+00> : vector<8x128xf32>
    %58 = tpu.matmul %56, %57, %cst_23 {dimension_numbers = #tpu.dot_dimension_numbers<[1], [0], [0], [1], [0, 0, 1, 1], [], []>} : vector<8x896xbf16>, vector<896x128xbf16>, vector<8x128xf32> -> vector<8x128xf32>
    %cst_24 = arith.constant dense<0.000000e+00> : vector<8xf32>
    %59 = vector.multi_reduction <add>, %58, %cst_24 [1] : vector<8x128xf32> to vector<8xf32>
    %60 = vector.shape_cast %59 : vector<8xf32> to vector<8x1xf32>
    %cst_25 = arith.constant 1.280000e+02 : f32
    %61 = vector.broadcast %cst_25 : f32 to vector<8x1xf32>
    %62 = arith.divf %60, %61 : vector<8x1xf32>
    %63 = vector.broadcast %62 : vector<8x1xf32> to vector<8x128xf32>
    %64 = arith.subf %58, %63 : vector<8x128xf32>
    %65 = arith.mulf %64, %64 : vector<8x128xf32>
    %cst_26 = arith.constant dense<0.000000e+00> : vector<8xf32>
    %66 = vector.multi_reduction <add>, %65, %cst_26 [1] : vector<8x128xf32> to vector<8xf32>
    %67 = vector.shape_cast %66 : vector<8xf32> to vector<8x1xf32>
    %cst_27 = arith.constant 1.280000e+02 : f32
    %68 = vector.broadcast %cst_27 : f32 to vector<8x1xf32>
    %69 = arith.divf %67, %68 : vector<8x1xf32>
    %cst_28 = arith.constant 9.99999974E-6 : f32
    %70 = vector.broadcast %cst_28 : f32 to vector<8x1xf32>
    %71 = arith.addf %69, %70 : vector<8x1xf32>
    %72 = math.rsqrt %71 : vector<8x1xf32>
    %73 = vector.broadcast %72 : vector<8x1xf32> to vector<8x128xf32>
    %74 = arith.mulf %64, %73 : vector<8x128xf32>
    %c0_29 = arith.constant 0 : index
    %c0_30 = arith.constant 0 : index
    %75 = vector.load %arg6[%c0_29, %c0_30] : memref<1x128xf32, #tpu.memory_space<vmem>>, vector<1x128xf32>
    %76 = vector.broadcast %75 : vector<1x128xf32> to vector<8x128xf32>
    %77 = arith.mulf %74, %76 : vector<8x128xf32>
    %c0_31 = arith.constant 0 : index
    %c0_32 = arith.constant 0 : index
    %78 = vector.load %arg7[%c0_31, %c0_32] : memref<1x128xf32, #tpu.memory_space<vmem>>, vector<1x128xf32>
    %79 = vector.broadcast %78 : vector<1x128xf32> to vector<8x128xf32>
    %80 = arith.addf %77, %79 : vector<8x128xf32>
    %81 = arith.truncf %80 : vector<8x128xf32> to vector<8x128xbf16>
    %c0_33 = arith.constant 0 : index
    %c0_34 = arith.constant 0 : index
    %82 = vector.load %arg8[%c0_33, %c0_34] : memref<128x256xbf16, #tpu.memory_space<vmem>>, vector<128x256xbf16>
    %cst_35 = arith.constant dense<0.000000e+00> : vector<8x256xf32>
    %83 = tpu.matmul %81, %82, %cst_35 {dimension_numbers = #tpu.dot_dimension_numbers<[1], [0], [0], [1], [0, 0, 1, 1], [], []>} : vector<8x128xbf16>, vector<128x256xbf16>, vector<8x256xf32> -> vector<8x256xf32>
    %c0_36 = arith.constant 0 : index
    %c0_37 = arith.constant 0 : index
    %84 = vector.load %arg9[%c0_36, %c0_37] : memref<1x256xf32, #tpu.memory_space<vmem>>, vector<1x256xf32>
    %85 = vector.broadcast %84 : vector<1x256xf32> to vector<8x256xf32>
    %86 = arith.addf %83, %85 : vector<8x256xf32>
    %c0_38 = arith.constant 0 : index
    %c0_39 = arith.constant 0 : index
    %87 = vector.load %arg10[%c0_38, %c0_39] : memref<8x256xf32, #tpu.memory_space<vmem>>, vector<8x256xf32>
    tpu.vector_store %arg10[%c0_38, %c0_39], %86 {strides = array<i32>} : memref<8x256xf32, #tpu.memory_space<vmem>>, vector<8x256xf32>,
    return
  }
  func.func @transform_0(%arg0: i32) -> (i32, i32) {
    %c0_i32 = arith.constant 0 : i32
    %c0_i32_0 = arith.constant 0 : i32
    return %arg0, %c0_i32 : i32, i32
  }
  func.func @transform_1(%arg0: i32) -> (i32, i32) {
    %c0_i32 = arith.constant 0 : i32
    %c0_i32_0 = arith.constant 0 : i32
    %c0_i32_1 = arith.constant 0 : i32
    return %c0_i32, %c0_i32_0 : i32, i32
  }
  func.func @transform_2(%arg0: i32) -> (i32, i32) {
    %c0_i32 = arith.constant 0 : i32
    %c0_i32_0 = arith.constant 0 : i32
    %c0_i32_1 = arith.constant 0 : i32
    return %c0_i32, %c0_i32_0 : i32, i32
  }
  func.func @transform_3(%arg0: i32) -> (i32, i32) {
    %c0_i32 = arith.constant 0 : i32
    %c0_i32_0 = arith.constant 0 : i32
    %c0_i32_1 = arith.constant 0 : i32
    return %c0_i32, %c0_i32_0 : i32, i32
  }
  func.func @transform_4(%arg0: i32) -> (i32, i32) {
    %c0_i32 = arith.constant 0 : i32
    %c0_i32_0 = arith.constant 0 : i32
    %c0_i32_1 = arith.constant 0 : i32
    return %c0_i32, %c0_i32_0 : i32, i32
  }
  func.func @transform_5(%arg0: i32) -> (i32, i32) {
    %c0_i32 = arith.constant 0 : i32
    %c0_i32_0 = arith.constant 0 : i32
    %c0_i32_1 = arith.constant 0 : i32
    return %c0_i32, %c0_i32_0 : i32, i32
  }
  func.func @transform_6(%arg0: i32) -> (i32, i32) {
    %c0_i32 = arith.constant 0 : i32
    %c0_i32_0 = arith.constant 0 : i32
    %c0_i32_1 = arith.constant 0 : i32
    return %c0_i32, %c0_i32_0 : i32, i32
  }
  func.func @transform_7(%arg0: i32) -> (i32, i32) {
    %c0_i32 = arith.constant 0 : i32
    %c0_i32_0 = arith.constant 0 : i32
    %c0_i32_1 = arith.constant 0 : i32
    return %c0_i32, %c0_i32_0 : i32, i32
  }
  func.func @transform_8(%arg0: i32) -> (i32, i32) {
    %c0_i32 = arith.constant 0 : i32
    %c0_i32_0 = arith.constant 0 : i32
    %c0_i32_1 = arith.constant 0 : i32
    return %c0_i32, %c0_i32_0 : i32, i32
  }
  func.func @transform_9(%arg0: i32) -> (i32, i32) {
    %c0_i32 = arith.constant 0 : i32
    %c0_i32_0 = arith.constant 0 : i32
    return %arg0, %c0_i32 : i32, i32
  }
  func.func @transform_10(%arg0: i32) -> (i32, i32) {
    %c0_i32 = arith.constant 0 : i32
    %c0_i32_0 = arith.constant 0 : i32
    return %arg0, %c0_i32 : i32, i32
  }
}

</mosaic_0001>

<bundles_post_ra>
// kernel: concept_aware_mgm_forward.1
= control target key start
LH: loop header
LB: loop body
LE: loop exit
PB: predicated region body
PF: predicated region fallthrough
CT: control target
= control target key end

     0   :  { %s3778_s0 = inlined_call_operand.vmem [shape: bf16[16,128], index: 0, kind: input, shape index: {}]   ;;  %s3779_s1 = inlined_call_operand.hbm [shape: bf16[128,896], index: 1, kind: input, shape index: {}]   ;;  %s3780_s2 = inlined_call_operand.vmem [shape: f32[1,896], index: 2, kind: input, shape index: {}]   ;;  %s3781_s3 = inlined_call_operand.hbm [shape: bf16[128,768], index: 3, kind: input, shape index: {}]   ;;  %s3782_s4 = inlined_call_operand.hbm [shape: bf16[896,128], index: 4, kind: input, shape index: {}]   ;;  %s3783_s5 = inlined_call_operand.vmem [shape: f32[1,128], index: 5, kind: input, shape index: {}]   ;;  %s3784_s6 = inlined_call_operand.vmem [shape: f32[1,128], index: 6, kind: input, shape index: {}]   ;;  %s3785_s7 = inlined_call_operand.hbm [shape: bf16[128,256], index: 7, kind: input, shape index: {}]   ;;  %s3786_s8 = inlined_call_operand.vmem [shape: f32[1,256], index: 8, kind: input, shape index: {}]   ;;  %s3787_s9 = inlined_call_operand.hbm [shape: f32[16,256], index: 9, kind: output, shape index: {0}]   ;;  %s3788_s10 = inlined_call_operand.vmem [shape: bf16[16,128], index: 10, kind: output, shape index: {1}]  }
   0x1   :  { %3794 = sst [smem:[#allocation20_spill]] %s3779_s1 }
   0x2   :  { %3795 = sst [smem:[#allocation21_spill]] %s3781_s3 }
   0x3   :  { %16 = vsyncpa [#allocation3], 0 }
   0x4   :  { %17 = vsyncpa [#allocation6], 0 }
   0x5   :  { %18 = vsyncpa [#allocation9], 0 }
   0x6   :  { %19 = vsyncpa [#allocation4], 0 }
   0x7   :  { %21 = vsyncpa [#allocation4 + $0x1], 0  ;;  %s3525_s13 = smov 0   ;;  %s3527_s14 = smov 0  }
   0x8   :  { %s3529_s15 = smov 0   ;;  %s3531_s16 = smov 0  }
   0x9 LB: > { %3796 = sst [smem:[#allocation15_spill]] %s3443_s13  ;;  %s3546_s17 = sadd.s32 4294967295, %s3455_s16   ;;  %s3455_s16 = sphi %s3531_s16, %s3809_s16   ;;  %s3451_s15 = sphi %s3529_s15, %s3811_s15   ;;  %s3447_s14 = sphi %s3527_s14, %s3813_s14   ;;  %s3443_s13 = sphi %s3525_s13, %s3812_s13  }
   0xa   : > { %3797 = sst [smem:[#allocation16_spill]] %s3451_s15  ;;  %s2248_s18 = sadd.s32 4294967294, %s3455_s16  }
   0xb   : > { %s3550_s19 = sadd.s32 1, %s3455_s16   ;;  %s228_s20 = sadd.s32 1, %s3451_s15 }
   0xc   : > { %3798 = sst [smem:[#allocation17_spill]] %s3550_s19  ;;  %s225_s21 = ssub.s32 %s3455_s16, %s3550_s19 }
   0xd   : > { %p238_p0 = scmp.ne.s32.totalorder %s3451_s15, %s3447_s14  ;;  %p226_p1 = scmp.eq.s32.totalorder %s225_s21, 0 }
   0xe   : > { %p239_p2 = scmp.eq.s32.totalorder %s3546_s17, 1  ;;  %p244_p3 = scmp.ne.s32.totalorder %s3447_s14, %s3443_s13 }
   0xf   : > { %p245_p4 = scmp.eq.s32.totalorder %s2248_s18, 1  ;;  %p2249_p7 = scmp.ge.s32.totalorder %s3455_s16, 1 }
  0x10   : > { %s3561_s22 = scalar_select %p226_p1, %s3451_s15, %s228_s20  }
  0x11   : > { %p3563_p5 = por %p239_p2, %p238_p0  ;;  %p3567_p6 = por %p245_p4, %p244_p3 }
  0x12   : > { %3799 = sst [smem:[#allocation18_spill]] %s3561_s22  ;;  %p278_p8 = scmp.lt.s32.totalorder %s3455_s16, 3 }
  0x13   : > { %s3801_s24 = scalar_select %p3567_p6, 1, 0 }
  0x14   : > { %p3184_p9 = scmp.eq.s32.totalorder %s3546_s17, 0  ;;  %p3574_p10 = pnand %p2249_p7, %p278_p8 }
  0x15   : > { %3802 = sst [smem:[#allocation19_spill]] %s3801_s24  ;;  %s3457_s29 = smov [#allocation5]  }
  0x16   : > { %s3804_s3 = sld [smem:[#allocation21_spill]]  ;;  %p3167_p11 = pneg %p3574_p10 }
  0x17   : > { %s308_s30 = sshll.u32 %s3457_s29, 4  ;;  %s3806_s1 = sld [smem:[#allocation20_spill]]  ;;  %s309_s30 = int_to_ptr.vmem [resolvable:$true] %s308_s30 }
  0x18   : > { %p3585_p12 = pnand %p3184_p9, %p3167_p11  ;;  %s3458_s21 = smov 384  }
  0x19   : > { %s3459_s26 = smov 24   ;;  %s3460_s27 = smov [#allocation2]  }
  0x1a   : > { %s291_s29 = sshll.u32 %s3460_s27, 4  ;;  %s3462_s22 = smov 28   ;;  %s292_s29 = int_to_ptr.vmem [resolvable:$true] %s291_s29 }
  0x1b   : > { %s320_s12 = sshll.u32 %s3782_s4, 4  ;;  %s3463_s18 = smov [#allocation7]   ;;  %s321_s12 = int_to_ptr.hbm [resolvable:$true] %s320_s12 }
  0x1c   : > { %s306_s28 = sshll.u32 %s3804_s3, 4  ;;  %s3461_s3 = smov 448   ;;  %s307_s28 = int_to_ptr.hbm [resolvable:$true] %s306_s28 }
  0x1d   : > { %s289_s20 = sshll.u32 %s3806_s1, 4  ;;  %s322_s1 = sshll.u32 %s3463_s18, 4  ;;  %s290_s20 = int_to_ptr.hbm [resolvable:$true] %s289_s20  ;;  %s323_s1 = int_to_ptr.vmem [resolvable:$true] %s322_s1 }
  0x1e   : > { %3173 = dma.hbm_to_vmem [thread:$0]  (!%p3585_p12), %s307_s28, 6144, %s309_s30, [#allocation6], %s3458_s21, %s3458_s21, %s3459_s26  }
  0x1f   : > { %3170 = dma.hbm_to_vmem [thread:$0]  (!%p3585_p12), %s290_s20, 7168, %s292_s29, [#allocation3], %s3461_s3, %s3461_s3, %s3462_s22  }
  0x20   : > { %s340_s28 = sshll.u32 %s3785_s7, 4  ;;  %s3464_s30 = smov 64   ;;  %s341_s28 = int_to_ptr.hbm [resolvable:$true] %s340_s28 }
  0x21   : > { %s3465_s21 = smov 4   ;;  %s3466_s26 = smov [#allocation8]  }
  0x22   : > { %3176 = dma.hbm_to_vmem [thread:$0]  (!%p3585_p12), %s321_s12, 7168, %s323_s1, [#allocation6], %s3464_s30, %s3464_s30, %s3465_s21  }
  0x23   : > { %s342_s3 = sshll.u32 %s3466_s26, 4  ;;  %s3467_s22 = smov 128   ;;  %s343_s3 = int_to_ptr.vmem [resolvable:$true] %s342_s3 }
  0x24   : > { %s3468_s15 = smov 8   ;;  %368 = sbr.rel (%p3574_p10) target bundleno = 1531 (0x5fb), region = 56 }
  0x25   : > { %3179 = dma.hbm_to_vmem [thread:$0]  (!%p3585_p12), %s341_s28, 2048, %s343_s3, [#allocation9], %s3467_s22, %s3467_s22, %s3468_s15  }
  0x29   : > { %3426 = dma.done.wait (%p3184_p9), [#allocation3], 7168  }
  0x2a   : > { %3428 = vsyncadd (%p3184_p9), [#allocation3], 4294960128 }
  0x2b   : > { %3430 = dma.done.wait (%p3184_p9), [#allocation6], 13312  }
  0x2c   : > { %3432 = vsyncadd (%p3184_p9), [#allocation6], 4294953984 }
  0x2d   : > { %3434 = dma.done.wait (%p3184_p9), [#allocation9], 2048  }
  0x2e   : > { %3436 = vsyncadd (%p3184_p9), [#allocation9], 4294965248  ;;  %v2461_v0 = vld [vmem:[#allocation2 + $0x188] sm:$0xf]  ;;  %v3024_v1 = vld [vmem:[#allocation2 + $0x1a0] sm:$0xf0]  ;;  %v893_v25 = vlaneseq }
  0x2f   : > { %v2433_v2 = vld [vmem:[#allocation2 + $0x150] sm:$0xf]  ;;  %v2462_v3 = vor.u32 %v3024_v1, %v2461_v0  ;;  %v3017_v4 = vld [vmem:[#allocation2 + $0x168] sm:$0xf0]  ;;  %v2405_v6 = vld [vmem:[#allocation2 + $0x118] sm:$0xf] }
  0x30   : > { %v2434_v5 = vor.u32 %v3017_v4, %v2433_v2  ;;  %v3010_v7 = vld [vmem:[#allocation2 + $0x130] sm:$0xf0]  ;;  %v2377_v9 = vld [vmem:[#allocation2 + $0xe0] sm:$0xf]  ;;  %v3003_v10 = vld [vmem:[#allocation2 + $0xf8] sm:$0xf0] }
  0x31   : > { %802 = vmatpush.bf16.msra.mxu0 %v2462_v3  ;;  %v2406_v8 = vor.u32 %v3010_v7, %v2405_v6  ;;  %v2378_v11 = vor.u32 %v3003_v10, %v2377_v9  ;;  %v2349_v12 = vld [vmem:[#allocation2 + $0xa8] sm:$0xf]  ;;  %v2996_v13 = vld [vmem:[#allocation2 + $0xc0] sm:$0xf0]  ;;  %v2321_v15 = vld [vmem:[#allocation2 + $0x70] sm:$0xf] }
  0x32   : > { %v2350_v14 = vor.u32 %v2996_v13, %v2349_v12  ;;  %v2989_v16 = vld [vmem:[#allocation2 + $0x88] sm:$0xf0]  ;;  %p425_p13 = scmp.lt.s32.totalorder %s3546_s17, 1  ;;  %v2293_v18 = vld [vmem:[#allocation2 + $0x38] sm:$0xf]  ;;  %v498_v26 = vld [vmem:[%s3780_s2] sm:$0xff] }
  0x33   : > { %v2322_v17 = vor.u32 %v2989_v16, %v2321_v15  ;;  %v2982_v19 = vld [vmem:[#allocation2 + $0x50] sm:$0xf0]  ;;  %v2265_v21 = vld [vmem:[#allocation2] sm:$0xf]  ;;  %v2975_v22 = vld [vmem:[#allocation2 + $0x18] sm:$0xf0] }
  0x34   : > { %s3622_s1 = scalar_select %p425_p13, %s3546_s17, 1  ;;  %v2294_v20 = vor.u32 %v2982_v19, %v2293_v18  ;;  %v2266_v23 = vor.u32 %v2975_v22, %v2265_v21  ;;  %v894_v27 = vand.u32 127, %v893_v25  ;;  %v500_v28 = vperm.slane %v498_v26, 0  ;;  %v2469_v47 = vld [vmem:[#allocation2 + $0x190] sm:$0xf] }
  0x35   : > { %803 = vmatpush.bf16.msra.mxu0 %v2434_v5  ;;  %v3025_v48 = vld [vmem:[#allocation2 + $0x1a8] sm:$0xf0]  ;;  %v2441_v49 = vld [vmem:[#allocation2 + $0x158] sm:$0xf]  ;;  %v3018_v51 = vld [vmem:[#allocation2 + $0x170] sm:$0xf0] }
  0x36   : > { %s2261_s13 = sshll.u32 %s3622_s1, 2  ;;  %vm895_vm0 = vcmp.lt.s32.totalorder %v894_v27, 3  ;;  %v2470_v50 = vor.u32 %v3025_v48, %v2469_v47  ;;  %v3021_v52 = vld [vmem:[#allocation2 + $0x18c] sm:$0xf]  ;;  %v2463_v53 = vld [vmem:[#allocation2 + $0x1a4] sm:$0xf0]  ;;  %v2442_v56 = vor.u32 %v3018_v51, %v2441_v49 }
  0x37   : > { %s428_s25 = scalar_lea.vmem %s3778_s0, %s2261_s13  ;;  %v2466_v54 = vor.u32 %v3021_v52, %v2463_v53  ;;  %v3014_v55 = vld [vmem:[#allocation2 + $0x154] sm:$0xf]  ;;  %v2435_v57 = vld [vmem:[#allocation2 + $0x16c] sm:$0xf0]  ;;  %v2413_v58 = vld [vmem:[#allocation2 + $0x120] sm:$0xf]  ;;  %s432_s12 = scalar_lea.vmem %s3788_s10, %s2261_s13 }
  0x38   : > { %v3630_v24 = vld [vmem:[%s428_s25] sm:$0xf]  ;;  %828 = vmatpush.bf16.msra.mxu2 %v2470_v50  ;;  %v3011_v59 = vld [vmem:[#allocation2 + $0x138] sm:$0xf0]  ;;  %v2438_v60 = vor.u32 %v3014_v55, %v2435_v57  ;;  %v2407_v62 = vld [vmem:[#allocation2 + $0x134] sm:$0xf0] }
  0x39   : > { %804 = vmatpush.bf16.msra.mxu0 %v2406_v8  ;;  %815 = vmatpush.bf16.msra.mxu1 %v2466_v54  ;;  %v3007_v61 = vld [vmem:[#allocation2 + $0x11c] sm:$0xf]  ;;  %v3022_v63 = vld [vmem:[#allocation2 + $0x194] sm:$0xf]  ;;  %v2414_v0 = vor.u32 %v3011_v59, %v2413_v58  ;;  %v2385_v1 = vld [vmem:[#allocation2 + $0xe8] sm:$0xf] }
  0x3a   : > { %v3004_v2 = vld [vmem:[#allocation2 + $0x100] sm:$0xf0]  ;;  %v2471_v3 = vld [vmem:[#allocation2 + $0x1ac] sm:$0xf0]  ;;  %v2410_v4 = vor.u32 %v3007_v61, %v2407_v62  ;;  %v2477_v7 = vld [vmem:[#allocation2 + $0x198] sm:$0xf] }
  0x3b   : > { %v3000_v5 = vld [vmem:[#allocation2 + $0xe4] sm:$0xf]  ;;  %v2474_v6 = vor.u32 %v3022_v63, %v2471_v3  ;;  %v3026_v8 = vld [vmem:[#allocation2 + $0x1b0] sm:$0xf0]  ;;  %v2379_v9 = vld [vmem:[#allocation2 + $0xfc] sm:$0xf0]  ;;  %v2386_v15 = vor.u32 %v3004_v2, %v2385_v1 }
  0x3c   : > { %829 = vmatpush.bf16.msra.mxu2 %v2442_v56  ;;  %v2478_v10 = vor.u32 %v3026_v8, %v2477_v7  ;;  %v2443_v12 = vld [vmem:[#allocation2 + $0x174] sm:$0xf0]  ;;  %v2357_v16 = vld [vmem:[#allocation2 + $0xb0] sm:$0xf]  ;;  %v2997_v18 = vld [vmem:[#allocation2 + $0xc8] sm:$0xf0]  ;;  %v2382_v19 = vor.u32 %v3000_v5, %v2379_v9 }
  0x3d   : > { %805 = vmatpush.bf16.msra.mxu0 %v2378_v11  ;;  %816 = vmatpush.bf16.msra.mxu1 %v2438_v60  ;;  %v3015_v11 = vld [vmem:[#allocation2 + $0x15c] sm:$0xf]  ;;  %v3008_v21 = vld [vmem:[#allocation2 + $0x124] sm:$0xf]  ;;  %v2415_v22 = vld [vmem:[#allocation2 + $0x13c] sm:$0xf0] }
  0x3e   : > { %841 = vmatpush.bf16.msra.mxu3 %v2474_v6  ;;  %v2446_v13 = vor.u32 %v3015_v11, %v2443_v12  ;;  %v2351_v25 = vld [vmem:[#allocation2 + $0xc4] sm:$0xf0]  ;;  %v2418_v26 = vor.u32 %v3008_v21, %v2415_v22  ;;  %v2983_v48 = vld [vmem:[#allocation2 + $0x58] sm:$0xf0]  ;;  %v2365_v50 = vld [vmem:[#allocation2 + $0xb8] sm:$0xf] }
  0x3f   : > { %v2998_v51 = vld [vmem:[#allocation2 + $0xd0] sm:$0xf0]  ;;  %v2979_v53 = vld [vmem:[#allocation2 + $0x3c] sm:$0xf]  ;;  %v2295_v54 = vld [vmem:[#allocation2 + $0x54] sm:$0xf0] }
  0x40   : > { %830 = vmatpush.bf16.msra.mxu2 %v2414_v0  ;;  %v2273_v55 = vld [vmem:[#allocation2 + $0x8] sm:$0xf]  ;;  %v2366_v59 = vor.u32 %v2998_v51, %v2365_v50  ;;  %v2987_v60 = vld [vmem:[#allocation2 + $0x7c] sm:$0xf]  ;;  %v2331_v61 = vld [vmem:[#allocation2 + $0x94] sm:$0xf0]  ;;  %v2298_v63 = vor.u32 %v2979_v53, %v2295_v54 }
  0x41   : > { %806 = vmatpush.bf16.msra.mxu0 %v2350_v14  ;;  %v2449_v14 = vld [vmem:[#allocation2 + $0x160] sm:$0xf]  ;;  %817 = vmatpush.bf16.msra.mxu1 %v2410_v4  ;;  %v2976_v62 = vld [vmem:[#allocation2 + $0x20] sm:$0xf0]  ;;  %v2991_v1 = vld [vmem:[#allocation2 + $0x98] sm:$0xf0]  ;;  %v2334_v5 = vor.u32 %v2987_v60, %v2331_v61 }
  0x42   : > { %842 = vmatpush.bf16.msra.mxu3 %v2446_v13  ;;  %v2337_v0 = vld [vmem:[#allocation2 + $0x80] sm:$0xf]  ;;  %v2972_v3 = vld [vmem:[#allocation2 + $0x4] sm:$0xf]  ;;  %v2274_v6 = vor.u32 %v2976_v62, %v2273_v55  ;;  %v3023_v7 = vld [vmem:[#allocation2 + $0x19c] sm:$0xf] }
  0x43   : > { %v2485_v2 = vld [vmem:[#allocation2 + $0x1a0] sm:$0xf]  ;;  %v2479_v8 = vld [vmem:[#allocation2 + $0x1b4] sm:$0xf0]  ;;  %v2338_v9 = vor.u32 %v2991_v1, %v2337_v0  ;;  %v2309_v13 = vld [vmem:[#allocation2 + $0x48] sm:$0xf] }
  0x44   : > { %831 = vmatpush.bf16.msra.mxu2 %v2386_v15  ;;  %v2267_v4 = vld [vmem:[#allocation2 + $0x1c] sm:$0xf0]  ;;  %v2457_v15 = vld [vmem:[#allocation2 + $0x168] sm:$0xf]  ;;  %v3016_v21 = vld [vmem:[#allocation2 + $0x164] sm:$0xf] }
  0x45   : > { %807 = vmatpush.bf16.msra.mxu0 %v2322_v17  ;;  %v3019_v17 = vld [vmem:[#allocation2 + $0x178] sm:$0xf0]  ;;  %818 = vmatpush.bf16.msra.mxu1 %v2382_v19  ;;  %v2303_v12 = vld [vmem:[#allocation2 + $0x5c] sm:$0xf0]  ;;  %v3064_v50 = vld [vmem:[#allocation5 + $0x124] sm:$0xf] }
  0x46   : > { %843 = vmatpush.bf16.msra.mxu3 %v2418_v26  ;;  %v2451_v22 = vld [vmem:[#allocation2 + $0x17c] sm:$0xf0]  ;;  %v2973_v26 = vld [vmem:[#allocation2 + $0xc] sm:$0xf]  ;;  %v2635_v51 = vld [vmem:[#allocation5 + $0x138] sm:$0xf0] }
  0x47   : > { %v2395_v53 = vld [vmem:[#allocation2 + $0x10c] sm:$0xf0]  ;;  %v2373_v55 = vld [vmem:[#allocation2 + $0xc0] sm:$0xf]  ;;  %v3061_v60 = vld [vmem:[#allocation5 + $0x104] sm:$0xf0] }
  0x48   : > { %v3058_v62 = vld [vmem:[#allocation5 + $0xf4] sm:$0xf]  ;;  %v2995_v0 = vld [vmem:[#allocation2 + $0xbc] sm:$0xf]  ;;  %v2367_v1 = vld [vmem:[#allocation2 + $0xd4] sm:$0xf0] }
  0x49   : > { %808 = vmatpush.bf16.msra.mxu0 %v2294_v20  ;;  %v2450_v20 = vor.u32 %v3019_v17, %v2449_v14  ;;  %v2984_v14 = vld [vmem:[#allocation2 + $0x60] sm:$0xf0]  ;;  %v2270_v17 = vor.u32 %v2972_v3, %v2267_v4  ;;  %s416_s22 = sand.u32 1, %s3447_s14   ;;  %s3148_s15 = sshll.u32 %s3546_s17, 4 }
  0x4a   : > { %v2992_v4 = vld [vmem:[#allocation2 + $0xa0] sm:$0xf0]  ;;  %s2260_s19 = sshll.u32 %s416_s22, 4  ;;  %s2116_s11 = scalar_lea.hbm %s3787_s9, %s3148_s15 }
  0x4b   : > { %s418_s20 = scalar_lea.vmem [#allocation10], %s2260_s19  ;;  %s2120_s29 = sshll.u32 %s2116_s11, 4  ;;  %s2121_s29 = int_to_ptr.hbm [resolvable:$true] %s2120_s29 }
  0x4c   : > { %s2118_s27 = sshll.u32 %s418_s20, 4  ;;  %s2101_s17 = scalar_lea.sflag [#allocation4], %s416_s22  ;;  %s2119_s27 = int_to_ptr.vmem [resolvable:$true] %s2118_s27 }
  0x4d   : > { %809 = vmatpush.bf16.msra.mxu0 %v2266_v23  ;;  %v2993_v23 = vld [vmem:[#allocation2 + $0xac] sm:$0xf]  ;;  %s3401_s21 = scalar_lea.hbm %s3787_s9, 32 }
  0x50   : > { %810 = vmatmul.bf16.vlgmr.msra.gmra.mxu0 %v3630_v24 }
  0x51   : > { %854 = vmatpush.bf16.msrb.mxu0 %v2478_v10  ;;  %v2980_v10 = vld [vmem:[#allocation2 + $0x44] sm:$0xf] }
  0x55   : > { %855 = vmatpush.bf16.msrb.mxu0 %v2450_v20  ;;  %v2429_v20 = vld [vmem:[#allocation2 + $0x130] sm:$0xf] }
  0xcd   : > { %v811_v29 = vpop.f32.mrf.mxu0 }
  0xce   : > { %v812_v30 = vadd.f32 %v811_v29, %v500_v28  ;;  %v3012_v28 = vld [vmem:[#allocation2 + $0x140] sm:$0xf0]  ;;  %v2358_v29 = vor.u32 %v2997_v18, %v2357_v16  ;;  %v2482_v18 = vor.u32 %v3023_v7, %v2479_v8  ;;  %v3055_v7 = vld [vmem:[#allocation5 + $0xd4] sm:$0xf0]  ;;  %v2370_v8 = vor.u32 %v2995_v0, %v2367_v1  ;;  %v3034_v0 = vld [vmem:[#allocation5 + $0x34] sm:$0xf] }
  0xcf   : > { %v3020_v16 = vld [vmem:[#allocation2 + $0x180] sm:$0xf0] }
  0xd0   : > { %v896_v31 = vsel %vm895_vm0, %v812_v30, 1e+30  ;;  %832 = vmatpush.bf16.msra.mxu2 %v2358_v29  ;;  %v2281_v29 = vld [vmem:[#allocation2 + $0x10] sm:$0xf] }
  0xd1   : > { %897 = vmin.xlane.f32.xlu0 %v896_v31 }
  0xd5   : > { %v813_v32 = vpop.f32.mrf.mxu0 }
  0xd6   : > { %v2387_v32 = vld [vmem:[#allocation2 + $0x104] sm:$0xf0] }
 0x144   : > { %v898_v33 = vpop.xlane.xlu0 %897 }
 0x145   : > { %vm899_vm1 = vcmp.eq.f32.partialorder %v896_v31, %v898_v33  ;;  %v3001_v31 = vld [vmem:[#allocation2 + $0xec] sm:$0xf]  ;;  %v2329_v33 = vld [vmem:[#allocation2 + $0x78] sm:$0xf] }
 0x146   : > { %vm900_vm2 = vmand %vm895_vm0, %vm899_vm1 }
 0x147   : > { %v901_v34 = vsel %vm900_vm2, %v894_v27, 4294967295 }
 0x148   : > { %v903_v35 = vshra.s32 %v901_v34, 16  ;;  %v902_v37 = vand.u32 65535, %v901_v34  ;;  %v2990_v34 = vld [vmem:[#allocation2 + $0x90] sm:$0xf0] }
 0x14a   : > { %v905_v36 = vcvt.s32.f32 %v903_v35  ;;  %v904_v39 = vcvt.s32.f32 %v902_v37  ;;  %v2354_v35 = vor.u32 %v2993_v23, %v2351_v25  ;;  %v2986_v37 = vld [vmem:[#allocation2 + $0x74] sm:$0xf]  ;;  %v2306_v23 = vor.u32 %v2980_v10, %v2303_v12  ;;  %v2587_v10 = vld [vmem:[#allocation5 + $0xd8] sm:$0xf0]  ;;  %v2339_v12 = vld [vmem:[#allocation2 + $0x9c] sm:$0xf0] }
 0x14b   : > { %v2310_v25 = vor.u32 %v2984_v14, %v2309_v13  ;;  %v2317_v14 = vld [vmem:[#allocation2 + $0x50] sm:$0xf] }
 0x14c   : > { %906 = vmax.xlane.f32.xlu0 %v905_v36  ;;  %819 = vmatpush.bf16.msra.mxu1 %v2354_v35  ;;  %v3070_v35 = vld [vmem:[#allocation5 + $0x154] sm:$0xf] }
 0x1bf   : > { %v907_v38 = vpop.xlane.xlu0 %906 }
 0x1c0   : > { %vm908_vm3 = vcmp.eq.f32.partialorder %v905_v36, %v907_v38  ;;  %v913_v41 = vcvt.f32.s32 %v907_v38  ;;  %v2393_v36 = vld [vmem:[#allocation2 + $0xf0] sm:$0xf] }
 0x1c1   : > { %v909_v40 = vsel %vm908_vm3, %v904_v39, -inf  ;;  %v2323_v38 = vld [vmem:[#allocation2 + $0x8c] sm:$0xf0]  ;;  %v3005_v39 = vld [vmem:[#allocation2 + $0x108] sm:$0xf0] }
 0x1c2   : > { %910 = vmax.xlane.f32.xlu1 %v909_v40  ;;  %v914_v43 = vshll.u32 %v913_v41, 16  ;;  %v2390_v40 = vor.u32 %v3001_v31, %v2387_v32  ;;  %v2330_v41 = vor.u32 %v2990_v34, %v2329_v33  ;;  %v2326_v49 = vor.u32 %v2986_v37, %v2323_v38  ;;  %v3013_v31 = vld [vmem:[#allocation2 + $0x148] sm:$0xf0]  ;;  %v2657_v32 = vld [vmem:[#allocation5 + $0x150] sm:$0xf] }
 0x1c3   : > { %v3073_v33 = vld [vmem:[#allocation5 + $0x164] sm:$0xf0]  ;;  %v2454_v34 = vor.u32 %v3016_v21, %v2451_v22  ;;  %v3009_v37 = vld [vmem:[#allocation2 + $0x12c] sm:$0xf]  ;;  %v3046_v22 = vld [vmem:[#allocation5 + $0x94] sm:$0xf] }
 0x1c4   : > { %844 = vmatpush.bf16.msra.mxu3 %v2390_v40  ;;  %833 = vmatpush.bf16.msra.mxu2 %v2330_v41  ;;  %v2423_v38 = vld [vmem:[#allocation2 + $0x144] sm:$0xf0]  ;;  %v2430_v41 = vor.u32 %v3013_v31, %v2429_v20  ;;  %v3071_v31 = vld [vmem:[#allocation5 + $0x15c] sm:$0xf] }
 0x1c5   : > { %820 = vmatpush.bf16.msra.mxu1 %v2326_v49  ;;  %v2426_v49 = vor.u32 %v3009_v37, %v2423_v38  ;;  %v3049_v20 = vld [vmem:[#allocation5 + $0xa4] sm:$0xf0]  ;;  %v3040_v37 = vld [vmem:[#allocation5 + $0x64] sm:$0xf]  ;;  %v2539_v38 = vld [vmem:[#allocation5 + $0x78] sm:$0xf0] }
 0x1c9   : > { %821 = vmatpush.bf16.msra.mxu1 %v2298_v63  ;;  %v2611_v63 = vld [vmem:[#allocation5 + $0x108] sm:$0xf0] }
 0x1cd   : > { %822 = vmatpush.bf16.msra.mxu1 %v2270_v17 }
 0x1d0   : > { %823 = vmatmul.bf16.vlgmr.msra.gmra.mxu1 %v3630_v24 }
 0x1d1   : > { %867 = vmatpush.bf16.msrb.mxu1 %v2482_v18  ;;  %v2561_v18 = vld [vmem:[#allocation5 + $0x90] sm:$0xf] }
 0x1d5   : > { %868 = vmatpush.bf16.msrb.mxu1 %v2454_v34  ;;  %v3043_v34 = vld [vmem:[#allocation5 + $0x74] sm:$0xf0] }
 0x1d9   : > { %869 = vmatpush.bf16.msrb.mxu1 %v2426_v49  ;;  %v3065_v49 = vld [vmem:[#allocation5 + $0x12c] sm:$0xf] }
 0x235   : > { %v911_v42 = vpop.xlane.xlu1 %910 }
 0x236   : > { %v912_v44 = vcvt.f32.s32 %v911_v42  ;;  %v2301_v42 = vld [vmem:[#allocation2 + $0x40] sm:$0xf] }
 0x237   : > { %v2302_v58 = vor.u32 %v2983_v48, %v2301_v42  ;;  %v2401_v42 = vld [vmem:[#allocation2 + $0xf8] sm:$0xf] }
 0x238   : > { %v915_v45 = vadd.s32 %v914_v43, %v912_v44  ;;  %v2394_v43 = vor.u32 %v3005_v39, %v2393_v36  ;;  %v2994_v44 = vld [vmem:[#allocation2 + $0xb4] sm:$0xf]  ;;  %v2659_v36 = vld [vmem:[#allocation5 + $0x168] sm:$0xf0]  ;;  %v3067_v48 = vld [vmem:[#allocation5 + $0x134] sm:$0xf0] }
 0x239   : > { %834 = vmatpush.bf16.msra.mxu2 %v2302_v58  ;;  %v2638_v58 = vor.u32 %v3064_v50, %v2635_v51  ;;  %v2643_v50 = vld [vmem:[#allocation5 + $0x140] sm:$0xf0] }
 0x23a   : > { %vm916_vm4 = vcmp.ne.s32.totalorder %v894_v27, %v915_v45  ;;  %v2421_v27 = vld [vmem:[#allocation2 + $0x128] sm:$0xf]  ;;  %v2359_v45 = vld [vmem:[#allocation2 + $0xcc] sm:$0xf0] }
 0x23b   : > { %vm917_vm5 = vmand %vm895_vm0, %vm916_vm4  ;;  %v2362_v56 = vor.u32 %v2994_v44, %v2359_v45  ;;  %v3006_v44 = vld [vmem:[#allocation2 + $0x110] sm:$0xf0]  ;;  %v2662_v45 = vor.u32 %v3070_v35, %v2659_v36 }
 0x23c   : > { %v3639_v46 = vsel %vm917_vm5, %v812_v30, -1e+30  ;;  %v2422_v30 = vor.u32 %v3012_v28, %v2421_v27  ;;  %v2458_v27 = vor.u32 %v3020_v16, %v2457_v15  ;;  %v2275_v28 = vld [vmem:[#allocation2 + $0x24] sm:$0xf0]  ;;  %v2402_v54 = vor.u32 %v3006_v44, %v2401_v42  ;;  %v2985_v16 = vld [vmem:[#allocation2 + $0x68] sm:$0xf0] }
 0x23d   : > { %919 = vmax.xlane.f32.xlu1 %v3639_v46  ;;  %845 = vmatpush.bf16.msra.mxu3 %v2362_v56  ;;  %v2278_v39 = vor.u32 %v2973_v26, %v2275_v28  ;;  %v2311_v26 = vld [vmem:[#allocation2 + $0x64] sm:$0xf0]  ;;  %v2289_v28 = vld [vmem:[#allocation2 + $0x18] sm:$0xf]  ;;  %v2667_v36 = vld [vmem:[#allocation5 + $0x170] sm:$0xf0] }
 0x23e   : > { %856 = vmatpush.bf16.msrb.mxu0 %v2422_v30  ;;  %835 = vmatpush.bf16.msra.mxu2 %v2274_v6  ;;  %v2977_v30 = vld [vmem:[#allocation2 + $0x28] sm:$0xf0]  ;;  %v2585_v6 = vld [vmem:[#allocation5 + $0xc0] sm:$0xf]  ;;  %v2665_v42 = vld [vmem:[#allocation5 + $0x158] sm:$0xf] }
 0x23f   : > { %v2282_v40 = vor.u32 %v2977_v30, %v2281_v29  ;;  %v2586_v15 = vor.u32 %v3055_v7, %v2585_v6  ;;  %v2978_v29 = vld [vmem:[#allocation2 + $0x30] sm:$0xf0]  ;;  %v2562_v30 = vor.u32 %v3049_v20, %v2561_v18  ;;  %v3053_v6 = vld [vmem:[#allocation5 + $0xcc] sm:$0xf]  ;;  %v2595_v7 = vld [vmem:[#allocation5 + $0xe0] sm:$0xf0] }
 0x240   : > { %v2571_v18 = vld [vmem:[#allocation5 + $0xb0] sm:$0xf0]  ;;  %v2673_v20 = vld [vmem:[#allocation5 + $0x160] sm:$0xf] }
 0x241   : > { %846 = vmatpush.bf16.msra.mxu3 %v2334_v5  ;;  %836 = vmatmul.bf16.vlgmr.msra.gmra.mxu2 %v3630_v24  ;;  %v2614_v5 = vor.u32 %v3058_v62, %v2611_v63  ;;  %v2513_v62 = vld [vmem:[#allocation5 + $0x30] sm:$0xf]  ;;  %v3037_v63 = vld [vmem:[#allocation5 + $0x44] sm:$0xf0] }
 0x242   : > { %857 = vmatpush.bf16.msrb.mxu0 %v2394_v43  ;;  %v2658_v43 = vor.u32 %v3073_v33, %v2657_v32  ;;  %v2537_v33 = vld [vmem:[#allocation5 + $0x60] sm:$0xf]  ;;  %v2514_v1 = vor.u32 %v3037_v63, %v2513_v62  ;;  %v3054_v62 = vld [vmem:[#allocation5 + $0xd4] sm:$0xf]  ;;  %v2603_v63 = vld [vmem:[#allocation5 + $0xe8] sm:$0xf0] }
 0x243   : > { %v2538_v44 = vor.u32 %v3043_v34, %v2537_v33  ;;  %v2649_v33 = vld [vmem:[#allocation5 + $0x130] sm:$0xf]  ;;  %v3069_v34 = vld [vmem:[#allocation5 + $0x144] sm:$0xf0] }
 0x245   : > { %847 = vmatpush.bf16.msra.mxu3 %v2306_v23  ;;  %v2563_v23 = vld [vmem:[#allocation5 + $0xa8] sm:$0xf0] }
 0x246   : > { %858 = vmatpush.bf16.msrb.mxu0 %v2366_v59  ;;  %v2609_v59 = vld [vmem:[#allocation5 + $0xf0] sm:$0xf]  ;;  %v2566_v32 = vor.u32 %v3046_v22, %v2563_v23  ;;  %v3075_v22 = vld [vmem:[#allocation5 + $0x174] sm:$0xf0]  ;;  %v3072_v23 = vld [vmem:[#allocation5 + $0x164] sm:$0xf] }
 0x247   : > { %v2610_v3 = vor.u32 %v3061_v60, %v2609_v59  ;;  %v3062_v59 = vld [vmem:[#allocation5 + $0x10c] sm:$0xf0] }
 0x249   : > { %848 = vmatpush.bf16.msra.mxu3 %v2278_v39  ;;  %v2974_v39 = vld [vmem:[#allocation2 + $0x14] sm:$0xf] }
 0x24a   : > { %859 = vmatpush.bf16.msrb.mxu0 %v2338_v9  ;;  %v3052_v9 = vld [vmem:[#allocation5 + $0xc4] sm:$0xf] }
 0x24b   : > { %v2590_v17 = vor.u32 %v3052_v9, %v2587_v10  ;;  %v3031_v9 = vld [vmem:[#allocation5 + $0x14] sm:$0xf0]  ;;  %v3028_v10 = vld [vmem:[#allocation5 + $0x4] sm:$0xf] }
 0x24c   : > { %849 = vmatmul.bf16.vlgmr.msra.gmra.mxu3 %v3630_v24 }
 0x24d   : > { %1231 = vmatpush.bf16.msrb.mxu3 %v2658_v43  ;;  %v3074_v43 = vld [vmem:[#allocation5 + $0x16c] sm:$0xf0] }
 0x24e   : > { %860 = vmatpush.bf16.msrb.mxu0 %v2310_v25  ;;  %v2981_v25 = vld [vmem:[#allocation2 + $0x4c] sm:$0xf]  ;;  %v2666_v51 = vor.u32 %v3074_v43, %v2665_v42  ;;  %v3035_v42 = vld [vmem:[#allocation5 + $0x3c] sm:$0xf] }
 0x24f   : > { %v2314_v35 = vor.u32 %v2981_v25, %v2311_v26  ;;  %v2675_v25 = vld [vmem:[#allocation5 + $0x178] sm:$0xf0]  ;;  %v2674_v26 = vor.u32 %v3075_v22, %v2673_v20  ;;  %v3030_v20 = vld [vmem:[#allocation5 + $0x14] sm:$0xf] }
 0x252   : > { %861 = vmatpush.bf16.msrb.mxu0 %v2282_v40  ;;  %v2283_v40 = vld [vmem:[#allocation2 + $0x2c] sm:$0xf0] }
 0x255   : > { %862 = vmatmul.bf16.vlgmr.msrb.gmra.mxu0 %v3630_v24 }
 0x256   : > { %1244 = vmatpush.bf16.msra.mxu0 %v2662_v45  ;;  %v2670_v45 = vor.u32 %v3071_v31, %v2667_v36  ;;  %v2650_v36 = vor.u32 %v3069_v34, %v2649_v33  ;;  %v3652_v33 = vpop.f32.mrf.mxu1 }
 0x25a   : > { %1245 = vmatpush.bf16.msra.mxu0 %v2638_v58  ;;  %v2617_v58 = vld [vmem:[#allocation5 + $0xf8] sm:$0xf] }
 0x25e   : > { %1246 = vmatpush.bf16.msra.mxu0 %v2614_v5 }
 0x262   : > { %1247 = vmatpush.bf16.msra.mxu0 %v2590_v17  ;;  %v3047_v17 = vld [vmem:[#allocation5 + $0x9c] sm:$0xf] }
 0x266   : > { %1248 = vmatpush.bf16.msra.mxu0 %v2566_v32  ;;  %v2547_v32 = vld [vmem:[#allocation5 + $0x80] sm:$0xf0] }
 0x2b0   : > { %v920_v47 = vpop.xlane.xlu1 %919 }
 0x2b1   : > { %v921_v52 = vsub.f32 %v3639_v46, %v920_v47  ;;  %v3027_v46 = vld [vmem:[#allocation2 + $0x1b8] sm:$0xf0]  ;;  %v2633_v47 = vld [vmem:[#allocation5 + $0x120] sm:$0xf] }
 0x2b2   : > { %v2486_v11 = vor.u32 %v3027_v46, %v2485_v2  ;;  %v2634_v56 = vor.u32 %v3067_v48, %v2633_v47  ;;  %v2345_v46 = vld [vmem:[#allocation2 + $0x88] sm:$0xf]  ;;  %v2542_v47 = vor.u32 %v3040_v37, %v2539_v38  ;;  %v2286_v48 = vor.u32 %v2974_v39, %v2283_v40  ;;  %v3066_v37 = vld [vmem:[#allocation5 + $0x134] sm:$0xf]  ;;  %v2651_v38 = vld [vmem:[#allocation5 + $0x148] sm:$0xf0] }
 0x2b3   : > { %v922_v57 = vmul.f32 1.442695, %v921_v52  ;;  %v3002_v52 = vld [vmem:[#allocation2 + $0xf4] sm:$0xf]  ;;  %v2346_v13 = vor.u32 %v2992_v4, %v2345_v46  ;;  %v2593_v46 = vld [vmem:[#allocation5 + $0xc8] sm:$0xf]  ;;  %v2654_v39 = vor.u32 %v3066_v37, %v2651_v38 }
 0x2b4   : > { %880 = vmatpush.bf16.msrb.mxu2 %v2486_v11  ;;  %v2398_v61 = vor.u32 %v3002_v52, %v2395_v53  ;;  %1232 = vmatpush.bf16.msrb.mxu3 %v2634_v56  ;;  %v2988_v11 = vld [vmem:[#allocation2 + $0x84] sm:$0xf]  ;;  %v2641_v52 = vld [vmem:[#allocation5 + $0x128] sm:$0xf]  ;;  %v3068_v53 = vld [vmem:[#allocation5 + $0x13c] sm:$0xf0] }
 0x2b5   : > { %3240 = vpow2.f32 %v922_v57  ;;  %v2999_v57 = vld [vmem:[#allocation2 + $0xd8] sm:$0xf0]  ;;  %v2342_v21 = vor.u32 %v2988_v11, %v2339_v12  ;;  %1249 = vmatpush.bf16.msra.mxu0 %v2542_v47  ;;  %v2619_v56 = vld [vmem:[#allocation5 + $0x110] sm:$0xf0]  ;;  %v2521_v40 = vld [vmem:[#allocation5 + $0x38] sm:$0xf] }
 0x2b6   : > { %v2374_v2 = vor.u32 %v2999_v57, %v2373_v55  ;;  %870 = vmatpush.bf16.msrb.mxu1 %v2398_v61  ;;  %v3059_v55 = vld [vmem:[#allocation5 + $0xfc] sm:$0xf]  ;;  %v2642_v57 = vor.u32 %v3068_v53, %v2641_v52  ;;  %v2618_v61 = vor.u32 %v3062_v59, %v2617_v58  ;;  %v3063_v47 = vld [vmem:[#allocation5 + $0x114] sm:$0xf0]  ;;  %v2497_v53 = vld [vmem:[#allocation5 + $0x8] sm:$0xf] }
 0x2b7   : > { %v2622_v60 = vor.u32 %v3059_v55, %v2619_v56  ;;  %v2491_v12 = vld [vmem:[#allocation5 + $0x18] sm:$0xf0]  ;;  %v3029_v55 = vld [vmem:[#allocation5 + $0xc] sm:$0xf]  ;;  %v2601_v58 = vld [vmem:[#allocation5 + $0xd0] sm:$0xf] }
 0x2b8   : > { %881 = vmatpush.bf16.msrb.mxu2 %v2458_v27  ;;  %1233 = vmatpush.bf16.msrb.mxu3 %v2610_v3  ;;  %v2318_v27 = vor.u32 %v2985_v16, %v2317_v14  ;;  %v3056_v3 = vld [vmem:[#allocation5 + $0xdc] sm:$0xf0]  ;;  %v3050_v14 = vld [vmem:[#allocation5 + $0xac] sm:$0xf0]  ;;  %v3057_v59 = vld [vmem:[#allocation5 + $0xe4] sm:$0xf0] }
 0x2b9   : > { %v2594_v5 = vor.u32 %v3056_v3, %v2593_v46  ;;  %v3048_v46 = vld [vmem:[#allocation5 + $0xa4] sm:$0xf] }
 0x2ba   : > { %871 = vmatpush.bf16.msrb.mxu1 %v2370_v8  ;;  %v2598_v8 = vor.u32 %v3053_v6, %v2595_v7  ;;  %v2553_v6 = vld [vmem:[#allocation5 + $0x70] sm:$0xf]  ;;  %v3045_v7 = vld [vmem:[#allocation5 + $0x84] sm:$0xf0] }
 0x2bb   : > { %v3643_v19 = vpop.eup %3240 }
 0x2bc   : > { %924 = vadd.xlane.f32.xlu2 %v3643_v19  ;;  %882 = vmatpush.bf16.msrb.mxu2 %v2430_v41  ;;  %v2290_v41 = vor.u32 %v2978_v29, %v2289_v28  ;;  %v2545_v28 = vld [vmem:[#allocation5 + $0x68] sm:$0xf]  ;;  %v3044_v29 = vld [vmem:[#allocation5 + $0x7c] sm:$0xf0] }
 0x2bd   : > { %1234 = vmatpush.bf16.msrb.mxu3 %v2586_v15  ;;  %v2494_v15 = vor.u32 %v3028_v10, %v2491_v12  ;;  %v2546_v31 = vor.u32 %v3044_v29, %v2545_v28  ;;  %v3039_v12 = vld [vmem:[#allocation5 + $0x54] sm:$0xf0] }
 0x2be   : > { %872 = vmatpush.bf16.msrb.mxu1 %v2342_v21  ;;  %v2574_v21 = vor.u32 %v3047_v17, %v2571_v18  ;;  %v2505_v17 = vld [vmem:[#allocation5 + $0x10] sm:$0xf]  ;;  %v3033_v18 = vld [vmem:[#allocation5 + $0x24] sm:$0xf0] }
 0x2c0   : > { %883 = vmatpush.bf16.msrb.mxu2 %v2402_v54  ;;  %v2646_v54 = vor.u32 %v3065_v49, %v2643_v50  ;;  %v3060_v50 = vld [vmem:[#allocation5 + $0x104] sm:$0xf] }
 0x2c1   : > { %1235 = vmatpush.bf16.msrb.mxu3 %v2562_v30  ;;  %v3041_v30 = vld [vmem:[#allocation5 + $0x6c] sm:$0xf] }
 0x2c2   : > { %873 = vmatpush.bf16.msrb.mxu1 %v2314_v35  ;;  %v2550_v35 = vor.u32 %v3041_v30, %v2547_v32 }
 0x2c4   : > { %884 = vmatpush.bf16.msrb.mxu2 %v2374_v2  ;;  %v2515_v2 = vld [vmem:[#allocation5 + $0x48] sm:$0xf0]  ;;  %v3655_v38 = vpop.f32.mrf.mxu2 }
 0x2c5   : > { %1236 = vmatpush.bf16.msrb.mxu3 %v2538_v44  ;;  %v2518_v4 = vor.u32 %v3034_v0, %v2515_v2  ;;  %v2523_v44 = vld [vmem:[#allocation5 + $0x50] sm:$0xf0]  ;;  %v2606_v0 = vor.u32 %v3054_v62, %v2603_v63  ;;  %v3051_v2 = vld [vmem:[#allocation5 + $0xb4] sm:$0xf0] }
 0x2c6   : > { %874 = vmatpush.bf16.msrb.mxu1 %v2286_v48  ;;  %v2526_v48 = vor.u32 %v3035_v42, %v2523_v44  ;;  %v3083_v42 = vld [vmem:[#allocation7 + $0x38] sm:$0xff]  ;;  %v3082_v44 = vld [vmem:[#allocation7 + $0x30] sm:$0xff] }
 0x2c7   : > { %1250 = vmatpush.bf16.msra.mxu0 %v2518_v4  ;;  %v2579_v4 = vld [vmem:[#allocation5 + $0xb8] sm:$0xf0] }
 0x2c8   : > { %885 = vmatpush.bf16.msrb.mxu2 %v2346_v13  ;;  %v2569_v13 = vld [vmem:[#allocation5 + $0x98] sm:$0xf] }
 0x2c9   : > { %875 = vmatmul.bf16.vlgmr.msrb.gmra.mxu1 %v3630_v24  ;;  %1237 = vmatpush.bf16.msrb.mxu3 %v2514_v1  ;;  %v2570_v16 = vor.u32 %v3050_v14, %v2569_v13  ;;  %v2577_v1 = vld [vmem:[#allocation5 + $0xa0] sm:$0xf]  ;;  %v3036_v13 = vld [vmem:[#allocation5 + $0x44] sm:$0xf]  ;;  %v2531_v14 = vld [vmem:[#allocation5 + $0x58] sm:$0xf0] }
 0x2ca   : > { %1257 = vmatpush.bf16.msra.mxu1 %v2666_v51  ;;  %v2627_v51 = vld [vmem:[#allocation5 + $0x118] sm:$0xf0]  ;;  %v2578_v3 = vor.u32 %v3051_v2, %v2577_v1  ;;  %v3078_v1 = vld [vmem:[#allocation7 + $0x10] sm:$0xff] }
 0x2cb   : > { %1251 = vmatpush.bf16.msra.mxu0 %v2494_v15  ;;  %v2630_v52 = vor.u32 %v3060_v50, %v2627_v51  ;;  %v3107_v50 = vld [vmem:[#allocation7 + $0xf8] sm:$0xff]  ;;  %v3081_v51 = vld [vmem:[#allocation7 + $0x28] sm:$0xff]  ;;  %v3086_v2 = vld [vmem:[#allocation7 + $0x50] sm:$0xff] }
 0x2cc   : > { %886 = vmatpush.bf16.msrb.mxu2 %v2318_v27  ;;  %v2678_v27 = vor.u32 %v3072_v23, %v2675_v25  ;;  %v2506_v23 = vor.u32 %v3033_v18, %v2505_v17  ;;  %v3087_v62 = vld [vmem:[#allocation7 + $0x58] sm:$0xff] }
 0x2cd   : > { %v3095_v63 = vld [vmem:[#allocation7 + $0x98] sm:$0xff] }
 0x2ce   : > { %1258 = vmatpush.bf16.msra.mxu1 %v2642_v57  ;;  %v2499_v57 = vld [vmem:[#allocation5 + $0x20] sm:$0xf0] }
 0x2cf   : > { %1296 = vmatpush.bf16.msrb.mxu0 %v2678_v27 }
 0x2d0   : > { %887 = vmatpush.bf16.msrb.mxu2 %v2290_v41  ;;  %v3038_v41 = vld [vmem:[#allocation5 + $0x4c] sm:$0xf0] }
 0x2d1   : > { %v2522_v43 = vor.u32 %v3038_v41, %v2521_v40  ;;  %v826_v41 = vpop.f32.mrf.mxu1 }
 0x2d2   : > { %1259 = vmatpush.bf16.msra.mxu1 %v2618_v61  ;;  %v2602_v61 = vor.u32 %v3057_v59, %v2601_v58  ;;  %v3664_v40 = vpop.f32.mrf.mxu0  ;;  %v3096_v58 = vld [vmem:[#allocation7 + $0xa0] sm:$0xff]  ;;  %v3105_v59 = vld [vmem:[#allocation7 + $0xe8] sm:$0xff] }
 0x2d3   : > { %888 = vmatmul.bf16.vlgmr.msrb.gmra.mxu2 %v3630_v24  ;;  %v2489_v24 = vld [vmem:[#allocation5] sm:$0xf]  ;;  %1297 = vmatpush.bf16.msrb.mxu0 %v2654_v39 }
 0x2d4   : > { %1270 = vmatpush.bf16.msra.mxu2 %v2670_v45  ;;  %v2490_v11 = vor.u32 %v3031_v9, %v2489_v24  ;;  %v2625_v45 = vld [vmem:[#allocation5 + $0x100] sm:$0xf]  ;;  %v2555_v24 = vld [vmem:[#allocation5 + $0x88] sm:$0xf0]  ;;  %v2554_v9 = vor.u32 %v3045_v7, %v2553_v6 }
 0x2d5   : > { %v2626_v49 = vor.u32 %v3063_v47, %v2625_v45  ;;  %v3090_v45 = vld [vmem:[#allocation7 + $0x70] sm:$0xff]  ;;  %v3093_v6 = vld [vmem:[#allocation7 + $0x88] sm:$0xff] }
 0x2d6   : > { %1260 = vmatpush.bf16.msra.mxu1 %v2594_v5  ;;  %1238 = vmatpush.bf16.msrb.mxu3 %v2490_v11  ;;  %v2582_v5 = vor.u32 %v3048_v46, %v2579_v4  ;;  %v2529_v11 = vld [vmem:[#allocation5 + $0x40] sm:$0xf]  ;;  %v3098_v47 = vld [vmem:[#allocation7 + $0xb0] sm:$0xff]  ;;  %v3077_v4 = vld [vmem:[#allocation7 + $0x8] sm:$0xff] }
 0x2d7   : > { %1298 = vmatpush.bf16.msrb.mxu0 %v2630_v52  ;;  %v2530_v15 = vor.u32 %v3039_v12, %v2529_v11  ;;  %v3089_v52 = vld [vmem:[#allocation7 + $0x68] sm:$0xff]  ;;  %v3094_v46 = vld [vmem:[#allocation7 + $0x90] sm:$0xff]  ;;  %v3260_v12 = vld [vmem:[%s3780_s2] sm:$0xff] }
 0x2d8   : > { %1271 = vmatpush.bf16.msra.mxu2 %v2646_v54  ;;  %v3032_v54 = vld [vmem:[#allocation5 + $0x1c] sm:$0xf0] }
 0x2d9   : > { %v2498_v56 = vor.u32 %v3032_v54, %v2497_v53  ;;  %v3097_v53 = vld [vmem:[#allocation7 + $0xa8] sm:$0xff] }
 0x2da   : > { %1261 = vmatpush.bf16.msra.mxu1 %v2570_v16  ;;  %1283 = vmatpush.bf16.msra.mxu3 %v2674_v26  ;;  %v2534_v16 = vor.u32 %v3036_v13, %v2531_v14  ;;  %v865_v54 = vpop.f32.mrf.mxu0  ;;  %v502_v13 = vperm.slane %v3260_v12, 2  ;;  %v501_v14 = vperm.slane %v3260_v12, 1 }
 0x2db   : > { %1299 = vmatpush.bf16.msrb.mxu0 %v2606_v0  ;;  %v3104_v0 = vld [vmem:[#allocation7 + $0xe0] sm:$0xff] }
 0x2dc   : > { %1272 = vmatpush.bf16.msra.mxu2 %v2622_v60  ;;  %v2502_v60 = vor.u32 %v3029_v55, %v2499_v57  ;;  %v3106_v55 = vld [vmem:[#allocation7 + $0xf0] sm:$0xff]  ;;  %v3088_v57 = vld [vmem:[#allocation7 + $0x60] sm:$0xff]  ;;  %v3681_v17 = vadd.f32 %v3655_v38, %v502_v13  ;;  %v3684_v18 = vadd.f32 %v3652_v33, %v501_v14 }
 0x2dd   : > { %v3114_v33 = vld [vmem:[#allocation7 + $0x130] sm:$0xff]  ;;  %v3112_v54 = vld [vmem:[#allocation7 + $0x120] sm:$0xff] }
 0x2de   : > { %1262 = vmatpush.bf16.msra.mxu1 %v2546_v31  ;;  %1284 = vmatpush.bf16.msra.mxu3 %v2650_v36 }
 0x2df   : > { %1300 = vmatpush.bf16.msrb.mxu0 %v2582_v5  ;;  %v3085_v5 = vld [vmem:[#allocation7 + $0x48] sm:$0xff] }
 0x2e0   : > { %1273 = vmatpush.bf16.msra.mxu2 %v2598_v8  ;;  %v3042_v8 = vld [vmem:[#allocation5 + $0x74] sm:$0xf] }
 0x2e1   : > { %v2558_v10 = vor.u32 %v3042_v8, %v2555_v24  ;;  %v3076_v8 = vld [vmem:[#allocation7] sm:$0xff] }
 0x2e2   : > { %1263 = vmatpush.bf16.msra.mxu1 %v2522_v43  ;;  %1285 = vmatpush.bf16.msra.mxu3 %v2626_v49  ;;  %v3099_v43 = vld [vmem:[#allocation7 + $0xb8] sm:$0xff]  ;;  %v839_v49 = vpop.f32.mrf.mxu2  ;;  %v3084_v24 = vld [vmem:[#allocation7 + $0x40] sm:$0xff] }
 0x2e3   : > { %1301 = vmatpush.bf16.msrb.mxu0 %v2558_v10 }
 0x2e4   : > { %1274 = vmatpush.bf16.msra.mxu2 %v2574_v21  ;;  %v2507_v21 = vld [vmem:[#allocation5 + $0x28] sm:$0xf0] }
 0x2e5   : > { %v2510_v25 = vor.u32 %v3030_v20, %v2507_v21 }
 0x2e6   : > { %1264 = vmatpush.bf16.msra.mxu1 %v2498_v56  ;;  %1286 = vmatpush.bf16.msra.mxu3 %v2602_v61  ;;  %v3080_v56 = vld [vmem:[#allocation7 + $0x20] sm:$0xff]  ;;  %v3079_v61 = vld [vmem:[#allocation7 + $0x18] sm:$0xff] }
 0x2e7   : > { %1302 = vmatpush.bf16.msrb.mxu0 %v2534_v16  ;;  %v504_v16 = vperm.slane %v3260_v12, 4 }
 0x2e8   : > { %1275 = vmatpush.bf16.msra.mxu2 %v2550_v35 }
 0x2e9   : > { %v3690_v21 = vadd.f32 %v3664_v40, %v504_v16 }
 0x2ea   : > { %1287 = vmatpush.bf16.msra.mxu3 %v2578_v3  ;;  %1841 = vmatpush.bf16.msrb.mxu1 %v3083_v42  ;;  %v506_v42 = vperm.slane %v3260_v12, 6 }
 0x2eb   : > { %1303 = vmatpush.bf16.msrb.mxu0 %v2510_v25  ;;  %v3103_v25 = vld [vmem:[#allocation7 + $0xd8] sm:$0xff] }
 0x2ec   : > { %1276 = vmatpush.bf16.msra.mxu2 %v2526_v48  ;;  %v3671_v48 = vpop.f32.mrf.mxu3 }
 0x2ee   : > { %1288 = vmatpush.bf16.msra.mxu3 %v2554_v9  ;;  %1842 = vmatpush.bf16.msrb.mxu1 %v3082_v44  ;;  %v3092_v9 = vld [vmem:[#allocation7 + $0x80] sm:$0xff]  ;;  %v3121_v44 = vld [vmem:[#allocation7 + $0x168] sm:$0xff] }
 0x2f0   : > { %1277 = vmatpush.bf16.msra.mxu2 %v2502_v60 }
 0x2f2   : > { %1289 = vmatpush.bf16.msra.mxu3 %v2530_v15  ;;  %1843 = vmatpush.bf16.msrb.mxu1 %v3081_v51  ;;  %v503_v15 = vperm.slane %v3260_v12, 3 }
 0x2f4   : > { %v852_v60 = vpop.f32.mrf.mxu3  ;;  %v3687_v20 = vadd.f32 %v3671_v48, %v503_v15  ;;  %v3129_v48 = vld [vmem:[#allocation7 + $0x1a8] sm:$0xff] }
 0x2f6   : > { %1290 = vmatpush.bf16.msra.mxu3 %v2506_v23  ;;  %1844 = vmatpush.bf16.msrb.mxu1 %v3080_v56  ;;  %v1309_v23 = vmul.f32 %v3684_v18, %v3684_v18 }
 0x2fa   : > { %1845 = vmatpush.bf16.msrb.mxu1 %v3079_v61 }
 0x2fe   : > { %1846 = vmatpush.bf16.msrb.mxu1 %v3078_v1  ;;  %v3127_v1 = vld [vmem:[#allocation7 + $0x198] sm:$0xff] }
 0x302   : > { %1847 = vmatpush.bf16.msrb.mxu1 %v3077_v4  ;;  %v3110_v4 = vld [vmem:[#allocation7 + $0x110] sm:$0xff] }
 0x306   : > { %1848 = vmatpush.bf16.msrb.mxu1 %v3076_v8 }
 0x32f   : > { %v925_v22 = vpop.xlane.xlu2 %924 }
 0x330   : > { %3242 = vrcp.f32 %v925_v22  ;;  %v937_v29 = vand.u32 2147483648, %v925_v22  ;;  %v935_v31 = vand.u32 2147483647, %v925_v22  ;;  %vm931_vm7 = vweird.f32 %v925_v22 }
 0x332   : > { %v938_v34 = vor.u32 1.1754944e-38, %v937_v29  ;;  %vm936_vm9 = vcmp.eq.f32.partialorder %v935_v31, 8.507059e+37  ;;  %v3131_v29 = vld [vmem:[#allocation7 + $0x1b8] sm:$0xff] }
 0x336   : > { %v3243_v26 = vpop.eup %3242 }
 0x337   : > { %v927_v27 = vmul.f32 %v3243_v26, %v925_v22  ;;  %vm932_vm6 = vweird.f32 %v3243_v26  ;;  %v1310_v22 = vmul.f32 %v3681_v17, %v3681_v17 }
 0x338   : > { %vm933_vm8 = vmor %vm931_vm7, %vm932_vm6 }
 0x339   : > { %v928_v28 = vsub.f32 1.0, %v927_v27  ;;  %v3123_v27 = vld [vmem:[#allocation7 + $0x178] sm:$0xff]  ;;  %v1316_v31 = vmul.f32 %v1310_v22, %v3681_v17 }
 0x33b   : > { %v929_v30 = vmul.f32 %v3243_v26, %v928_v28  ;;  %v1311_v28 = vmul.f32 %v3687_v20, %v3687_v20  ;;  %v1322_v40 = vmul.f32 0.044715, %v1316_v31 }
 0x33d   : > { %v930_v32 = vadd.f32 %v3243_v26, %v929_v30  ;;  %v1312_v30 = vmul.f32 %v3690_v21, %v3690_v21 }
 0x33f   : > { %v934_v35 = vsel %vm933_vm8, %v3243_v26, %v930_v32  ;;  %v3115_v26 = vld [vmem:[#allocation7 + $0x138] sm:$0xff]  ;;  %v3102_v32 = vld [vmem:[#allocation7 + $0xd0] sm:$0xff]  ;;  %v1318_v38 = vmul.f32 %v1312_v30, %v3690_v21 }
 0x340   : > { %v939_v36 = vsel %vm936_vm9, %v938_v34, %v934_v35  ;;  %v3122_v34 = vld [vmem:[#allocation7 + $0x170] sm:$0xff]  ;;  %v1315_v35 = vmul.f32 %v1309_v23, %v3684_v18  ;;  %v3108_v23 = vld [vmem:[#allocation7 + $0x100] sm:$0xff] }
 0x341   : > { %v940_v37 = vmul.f32 %v3643_v19, %v939_v36  ;;  %v3091_v19 = vld [vmem:[#allocation7 + $0x78] sm:$0xff]  ;;  %v3130_v36 = vld [vmem:[#allocation7 + $0x1b0] sm:$0xff]  ;;  %v1324_v49 = vmul.f32 0.044715, %v1318_v38 }
 0x342   : > { %1854 = vmatpush.bf16.msrb.mxu2 %v3091_v19  ;;  %v1321_v41 = vmul.f32 0.044715, %v1315_v35  ;;  %v3101_v19 = vld [vmem:[#allocation7 + $0xc8] sm:$0xff] }
 0x343   : > { %v3662_v39 = vpack.c.bf16 %v940_v37, %v940_v37  ;;  %v1317_v37 = vmul.f32 %v1311_v28, %v3687_v20 }
 0x345   : > { %942 = vst [vmem:[%s432_s12] sm:$0xf] %v3662_v39  ;;  %1239 = vmatmul.bf16.vlgmr.msrb.gmra.mxu3 %v3662_v39  ;;  %1252 = vmatmul.bf16.vlgmr.msra.gmra.mxu0 %v3662_v39  ;;  %s3395_s12 = sshra.s32 %s2121_s29, 4  ;;  %s3396_s12 = int_to_ptr.hbm [resolvable:$true] %s3395_s12 }
 0x346   : > { %1265 = vmatmul.bf16.vlgmr.msra.gmra.mxu1 %v3662_v39  ;;  %1278 = vmatmul.bf16.vlgmr.msra.gmra.mxu2 %v3662_v39  ;;  %v3675_v3 = vpop.f32.mrf.mxu1  ;;  %s3397_s18 = scalar_lea.hbm %s3396_s12, 16  ;;  %p3402_p3 = scmp.lt.s32.totalorder %s3396_s12, %s3787_s9 }
 0x347   : > { %1867 = vmatpush.bf16.msrb.mxu3 %v3099_v43  ;;  %1855 = vmatpush.bf16.msrb.mxu2 %v3090_v45  ;;  %v3113_v43 = vld [vmem:[#allocation7 + $0x128] sm:$0xff]  ;;  %v1323_v45 = vmul.f32 0.044715, %v1317_v37  ;;  %p3398_p0 = scmp.ne.s32.totalorder %s3396_s12, %s3397_s18  ;;  %p3403_p4 = scmp.lt.s32.totalorder %s3401_s21, %s3397_s18 }
 0x348   : > { %1880 = vmatpush.bf16.msra.mxu0 %v3107_v50  ;;  %1893 = vmatpush.bf16.msra.mxu1 %v3115_v26  ;;  %v1328_v50 = vadd.f32 %v1322_v40, %v3681_v17  ;;  %v3124_v26 = vld [vmem:[#allocation7 + $0x180] sm:$0xff] }
 0x349   : > { %p3399_p1 = pnand %p3398_p0, %p3563_p5  ;;  %p3404_p7 = por %p3403_p4, %p3402_p3 }
 0x34a   : > { %v1334_v60 = vmul.f32 0.7978846, %v1328_v50 }
 0x34b   : > { %1868 = vmatpush.bf16.msrb.mxu3 %v3098_v47  ;;  %1856 = vmatpush.bf16.msrb.mxu2 %v3089_v52  ;;  %v505_v47 = vperm.slane %v3260_v12, 5  ;;  %v1327_v52 = vadd.f32 %v1321_v41, %v3684_v18  ;;  %p3400_p2 = pneg %p3399_p1 }
 0x34c   : > { %1881 = vmatpush.bf16.msra.mxu0 %v3106_v55  ;;  %1894 = vmatpush.bf16.msra.mxu1 %v3114_v33  ;;  %v3120_v55 = vld [vmem:[#allocation7 + $0x160] sm:$0xff]  ;;  %3244 = vtanh.f32 %v1334_v60 }
 0x34d   : > { %v3709_v56 = vadd.f32 %v3675_v3, %v505_v47  ;;  %p3405_p8 = pnand %p3404_p7, %p3400_p2 }
 0x34e   : > { %v878_v10 = vpop.f32.mrf.mxu1 }
 0x34f   : > { %1869 = vmatpush.bf16.msrb.mxu3 %v3097_v53  ;;  %1857 = vmatpush.bf16.msrb.mxu2 %v3088_v57  ;;  %v3100_v53 = vld [vmem:[#allocation7 + $0xc0] sm:$0xff]  ;;  %v1329_v57 = vadd.f32 %v1323_v45, %v3687_v20  ;;  %v3117_v10 = vld [vmem:[#allocation7 + $0x148] sm:$0xff] }
 0x350   : > { %1882 = vmatpush.bf16.msra.mxu0 %v3105_v59  ;;  %1895 = vmatpush.bf16.msra.mxu1 %v3113_v43  ;;  %v1330_v59 = vadd.f32 %v1324_v49, %v3690_v21 }
 0x352   : > { %v1336_v3 = vmul.f32 0.7978846, %v1330_v59  ;;  %v3245_v12 = vpop.eup %3244 }
 0x353   : > { %1870 = vmatpush.bf16.msrb.mxu3 %v3096_v58  ;;  %1858 = vmatpush.bf16.msrb.mxu2 %v3087_v62  ;;  %v3128_v58 = vld [vmem:[#allocation7 + $0x1a0] sm:$0xff]  ;;  %v1333_v62 = vmul.f32 0.7978846, %v1327_v52  ;;  %v1346_v28 = vadd.f32 1.0, %v3245_v12 }
 0x354   : > { %1883 = vmatpush.bf16.msra.mxu0 %v3104_v0  ;;  %1896 = vmatpush.bf16.msra.mxu1 %v3112_v54  ;;  %v3119_v0 = vld [vmem:[#allocation7 + $0x158] sm:$0xff] }
 0x355   : > { %1291 = vmatmul.bf16.vlgmr.msra.gmra.mxu3 %v3662_v39  ;;  %1304 = vmatmul.bf16.vlgmr.msrb.gmra.mxu0 %v3662_v39  ;;  %3246 = vtanh.f32 %v1333_v62  ;;  %v1352_v35 = vmul.f32 0.5, %v1346_v28 }
 0x356   : > { %v889_v7 = vpop.f32.mrf.mxu2 }
 0x357   : > { %1871 = vmatpush.bf16.msrb.mxu3 %v3095_v63  ;;  %1859 = vmatpush.bf16.msrb.mxu2 %v3086_v2  ;;  %v3705_v51 = vadd.f32 %v889_v7, %v506_v42  ;;  %v3111_v63 = vld [vmem:[#allocation7 + $0x118] sm:$0xff]  ;;  %v1313_v2 = vmul.f32 %v3709_v56, %v3709_v56  ;;  %v1358_v41 = vmul.f32 %v1352_v35, %v3681_v17 }
 0x358   : > { %1884 = vmatpush.bf16.msra.mxu0 %v3103_v25  ;;  %1897 = vmatpush.bf16.msra.mxu1 %v3111_v63  ;;  %v3116_v25 = vld [vmem:[#allocation7 + $0x140] sm:$0xff] }
 0x359   : > { %v1314_v61 = vmul.f32 %v3705_v51, %v3705_v51  ;;  %v1319_v8 = vmul.f32 %v1313_v2, %v3709_v56 }
 0x35b   : > { %1872 = vmatpush.bf16.msrb.mxu3 %v3094_v46  ;;  %1860 = vmatpush.bf16.msrb.mxu2 %v3085_v5  ;;  %v1335_v46 = vmul.f32 0.7978846, %v1329_v57  ;;  %v3118_v5 = vld [vmem:[#allocation7 + $0x150] sm:$0xff]  ;;  %v1320_v7 = vmul.f32 %v1314_v61, %v3705_v51  ;;  %v1325_v13 = vmul.f32 0.044715, %v1319_v8  ;;  %v3247_v14 = vpop.eup %3246 }
 0x35c   : > { %1885 = vmatpush.bf16.msra.mxu0 %v3102_v32  ;;  %1898 = vmatpush.bf16.msra.mxu1 %v3110_v4 }
 0x35d   : > { %3248 = vtanh.f32 %v1335_v46 }
 0x35e   : > { %v891_v11 = vpop.f32.mrf.mxu2  ;;  %3250 = vtanh.f32 %v1336_v3 }
 0x35f   : > { %1873 = vmatpush.bf16.msrb.mxu3 %v3093_v6  ;;  %1861 = vmatpush.bf16.msrb.mxu2 %v3084_v24  ;;  %v3126_v6 = vld [vmem:[#allocation7 + $0x190] sm:$0xff]  ;;  %v1326_v24 = vmul.f32 0.044715, %v1320_v7  ;;  %v3125_v11 = vld [vmem:[#allocation7 + $0x188] sm:$0xff] }
 0x360   : > { %1886 = vmatpush.bf16.msra.mxu0 %v3101_v19 }
 0x361   : > { %v1332_v22 = vadd.f32 %v1326_v24, %v3705_v51 }
 0x363   : > { %1874 = vmatpush.bf16.msrb.mxu3 %v3092_v9  ;;  %1906 = vmatpush.bf16.msra.mxu2 %v3123_v27  ;;  %v3109_v9 = vld [vmem:[#allocation7 + $0x108] sm:$0xff]  ;;  %v3249_v15 = vpop.eup %3248  ;;  %v1331_v27 = vadd.f32 %v1325_v13, %v3709_v56  ;;  %v1338_v32 = vmul.f32 0.7978846, %v1332_v22 }
 0x364   : > { %1887 = vmatpush.bf16.msra.mxu0 %v3100_v53  ;;  %1899 = vmatpush.bf16.msra.mxu1 %v3109_v9  ;;  %v3251_v16 = vpop.eup %3250  ;;  %v1347_v30 = vadd.f32 1.0, %v3249_v15 }
 0x365   : > { %v1348_v31 = vadd.f32 1.0, %v3251_v16  ;;  %3252 = vtanh.f32 %v1338_v32 }
 0x366   : > { %v1353_v38 = vmul.f32 0.5, %v1347_v30 }
 0x367   : > { %1919 = vmatpush.bf16.msra.mxu3 %v3131_v29  ;;  %1907 = vmatpush.bf16.msra.mxu2 %v3122_v34  ;;  %v1345_v29 = vadd.f32 1.0, %v3247_v14  ;;  %v1337_v34 = vmul.f32 0.7978846, %v1331_v27  ;;  %v1354_v40 = vmul.f32 0.5, %v1348_v31 }
 0x368   : > { %1900 = vmatpush.bf16.msra.mxu1 %v3108_v23  ;;  %v1359_v19 = vmul.f32 %v1353_v38, %v3687_v20 }
 0x369   : > { %v1351_v37 = vmul.f32 0.5, %v1345_v29  ;;  %3254 = vtanh.f32 %v1337_v34 }
 0x36b   : > { %1920 = vmatpush.bf16.msra.mxu3 %v3130_v36  ;;  %1908 = vmatpush.bf16.msra.mxu2 %v3121_v44  ;;  %v1357_v42 = vmul.f32 %v1351_v37, %v3684_v18  ;;  %v1360_v44 = vmul.f32 %v1354_v40, %v3690_v21  ;;  %v3253_v53 = vpop.eup %3252  ;;  %v3469_v40 = vmov 128.0  }
 0x36c   : > { %v1350_v62 = vadd.f32 1.0, %v3253_v53  ;;  %3256 = vrcp.f32 %v3469_v40 }
 0x36e   : > { %v1356_v3 = vmul.f32 0.5, %v1350_v62  ;;  %v2945_v62 = vld [vmem:[#allocation8 + $0x50] sm:$0xf] }
 0x36f   : > { %1921 = vmatpush.bf16.msra.mxu3 %v3129_v48  ;;  %1909 = vmatpush.bf16.msra.mxu2 %v3120_v55  ;;  %v3255_v57 = vpop.eup %3254 }
 0x370   : > { %v1349_v63 = vadd.f32 1.0, %v3255_v57 }
 0x372   : > { %v1355_v4 = vmul.f32 0.5, %v1349_v63  ;;  %v3143_v63 = vld [vmem:[#allocation8 + $0x54] sm:$0xf0] }
 0x373   : > { %1922 = vmatpush.bf16.msra.mxu3 %v3128_v58  ;;  %1910 = vmatpush.bf16.msra.mxu2 %v3119_v0 }
 0x377   : > { %1923 = vmatpush.bf16.msra.mxu3 %v3127_v1  ;;  %1911 = vmatpush.bf16.msra.mxu2 %v3118_v5  ;;  %v1362_v5 = vmul.f32 %v1356_v3, %v3705_v51  ;;  %v3141_v3 = vld [vmem:[#allocation8 + $0x44] sm:$0xf0] }
 0x37b   : > { %1924 = vmatpush.bf16.msra.mxu3 %v3126_v6  ;;  %1912 = vmatpush.bf16.msra.mxu2 %v3117_v10  ;;  %v1361_v6 = vmul.f32 %v1355_v4, %v3709_v56  ;;  %v3140_v4 = vld [vmem:[#allocation8 + $0x44] sm:$0xf] }
 0x37f   : > { %1925 = vmatpush.bf16.msra.mxu3 %v3125_v11  ;;  %1913 = vmatpush.bf16.msra.mxu2 %v3116_v25 }
 0x383   : > { %1926 = vmatpush.bf16.msra.mxu3 %v3124_v26 }
 0x3c2   : > { %v1253_v33 = vpop.f32.mrf.mxu0 }
 0x3c3   : > { %v1266_v36 = vpop.f32.mrf.mxu1  ;;  %v1364_v45 = vmul.f32 %v1358_v41, %v1253_v33  ;;  %v2961_v41 = vld [vmem:[#allocation8 + $0x70] sm:$0xf] }
 0x3c4   : > { %v1365_v49 = vmul.f32 %v1359_v19, %v1266_v36  ;;  %v3146_v19 = vld [vmem:[#allocation8 + $0x74] sm:$0xf] }
 0x3c8   : > { %v1240_v43 = vpop.f32.mrf.mxu3 }
 0x3c9   : > { %v1363_v47 = vmul.f32 %v1357_v42, %v1240_v43  ;;  %v1279_v48 = vpop.f32.mrf.mxu2  ;;  %v3147_v42 = vld [vmem:[#allocation8 + $0x74] sm:$0xf0] }
 0x3ca   : > { %v1366_v50 = vmul.f32 %v1360_v44, %v1279_v48  ;;  %v1255_v52 = vpop.f32.mrf.mxu0  ;;  %v2962_v43 = vor.u32 %v3147_v42, %v2961_v41  ;;  %v2963_v44 = vld [vmem:[#allocation8 + $0x78] sm:$0xf0] }
 0x3cb   : > { %v1369_v54 = vpack.c.bf16 %v1364_v45, %v1363_v47  ;;  %v1268_v55 = vpop.f32.mrf.mxu1  ;;  %v2966_v45 = vor.u32 %v3146_v19, %v2963_v44  ;;  %v3257_v47 = vpop.eup %3256 }
 0x3cc   : > { %v1370_v58 = vpack.c.bf16 %v1366_v50, %v1365_v49  ;;  %2072 = vmatpush.bf16.msrb.mxu0 %v2962_v43  ;;  %v1935_v48 = vmul.f32 128.0, %v3257_v47  ;;  %vm1939_vm10 = vweird.f32 %v3257_v47  ;;  %v3238_v43 = vld [vmem:[%s3783_s5] ss:$0 sm:$0xff] }
 0x3cd   : > { %v1375_v59 = vunpack.c.l.b16 %v1369_v54  ;;  %v1376_v17 = vunpack.c.h.b16 %v1369_v54 }
 0x3ce   : > { %v1377_v60 = vunpack.c.l.b16 %v1370_v58  ;;  %v1378_v18 = vunpack.c.h.b16 %v1370_v58  ;;  %v1936_v49 = vsub.f32 1.0, %v1935_v48 }
 0x3cf   : > { %v1381_v61 = vpack.c.b16 %v1375_v59, %v1375_v59  ;;  %v1382_v20 = vpack.c.b16 %v1376_v17, %v1376_v17  ;;  %v2953_v59 = vld [vmem:[#allocation8 + $0x60] sm:$0xf]  ;;  %v3145_v17 = vld [vmem:[#allocation8 + $0x64] sm:$0xf0] }
 0x3d0   : > { %v1383_v21 = vpack.c.b16 %v1377_v60, %v1377_v60  ;;  %v1384_v0 = vpack.c.b16 %v1378_v18, %v1378_v18  ;;  %v1242_v1 = vpop.f32.mrf.mxu3  ;;  %v1937_v50 = vmul.f32 %v3257_v47, %v1936_v49  ;;  %v3144_v60 = vld [vmem:[#allocation8 + $0x64] sm:$0xf]  ;;  %v2954_v18 = vor.u32 %v3145_v17, %v2953_v59 }
 0x3d1   : > { %v1281_v2 = vpop.f32.mrf.mxu2  ;;  %1849 = vmatmul.bf16.vlgmr.msrb.gmra.mxu1 %v1381_v61  ;;  %1862 = vmatmul.bf16.vlgmr.msrb.gmra.mxu2 %v1382_v20  ;;  %v2955_v61 = vld [vmem:[#allocation8 + $0x68] sm:$0xf0]  ;;  %v2947_v1 = vld [vmem:[#allocation8 + $0x58] sm:$0xf0] }
 0x3d2   : > { %1875 = vmatmul.bf16.vlgmr.msrb.gmra.mxu3 %v1383_v21  ;;  %1888 = vmatmul.bf16.vlgmr.msra.gmra.mxu0 %v1384_v0  ;;  %v1305_v46 = vpop.f32.mrf.mxu0  ;;  %v1938_v52 = vadd.f32 %v3257_v47, %v1937_v50  ;;  %v2958_v20 = vor.u32 %v3144_v60, %v2955_v61  ;;  %v3142_v21 = vld [vmem:[#allocation8 + $0x54] sm:$0xf]  ;;  %v2946_v0 = vor.u32 %v3143_v63, %v2945_v62 }
 0x3d3   : > { %v1368_v8 = vmul.f32 %v1362_v5, %v1305_v46  ;;  %2085 = vmatpush.bf16.msrb.mxu1 %v2966_v45  ;;  %2073 = vmatpush.bf16.msrb.mxu0 %v2954_v18  ;;  %v2950_v2 = vor.u32 %v3142_v21, %v2947_v1  ;;  %v2937_v46 = vld [vmem:[#allocation8 + $0x40] sm:$0xf] }
 0x3d4   : > { %v3728_v53 = vsel %vm1939_vm10, %v3257_v47, %v1938_v52  ;;  %v2938_v5 = vor.u32 %v3141_v3, %v2937_v46  ;;  %v3239_v47 = vld [vmem:[%s3784_s6] ss:$0 sm:$0xff] }
 0x3d5   : > { %v1986_v52 = vld [vmem:[%s3786_s8] sm:$0x3] }
 0x3d7   : > { %2086 = vmatpush.bf16.msrb.mxu1 %v2958_v20  ;;  %2074 = vmatpush.bf16.msrb.mxu0 %v2946_v0 }
 0x3d8   : > { %v1292_v7 = vpop.f32.mrf.mxu3 }
 0x3d9   : > { %v1367_v24 = vmul.f32 %v1361_v6, %v1292_v7  ;;  %v2939_v6 = vld [vmem:[#allocation8 + $0x48] sm:$0xf0] }
 0x3da   : > { %v1307_v9 = vpop.f32.mrf.mxu0  ;;  %v2942_v7 = vor.u32 %v3140_v4, %v2939_v6 }
 0x3db   : > { %v1371_v10 = vpack.c.bf16 %v1368_v8, %v1367_v24  ;;  %2087 = vmatpush.bf16.msrb.mxu1 %v2950_v2  ;;  %2075 = vmatpush.bf16.msrb.mxu0 %v2938_v5  ;;  %v2929_v8 = vld [vmem:[#allocation8 + $0x30] sm:$0xf]  ;;  %v3139_v24 = vld [vmem:[#allocation8 + $0x34] sm:$0xf0]  ;;  %v3138_v9 = vld [vmem:[#allocation8 + $0x34] sm:$0xf] }
 0x3dd   : > { %v1379_v11 = vunpack.c.l.b16 %v1371_v10  ;;  %v1380_v12 = vunpack.c.h.b16 %v1371_v10  ;;  %v2930_v10 = vor.u32 %v3139_v24, %v2929_v8 }
 0x3df   : > { %v1385_v13 = vpack.c.b16 %v1379_v11, %v1379_v11  ;;  %v1386_v14 = vpack.c.b16 %v1380_v12, %v1380_v12  ;;  %2088 = vmatpush.bf16.msrb.mxu1 %v2942_v7  ;;  %v2931_v11 = vld [vmem:[#allocation8 + $0x38] sm:$0xf0]  ;;  %2076 = vmatpush.bf16.msrb.mxu0 %v2930_v10 }
 0x3e0   : > { %v1294_v15 = vpop.f32.mrf.mxu3  ;;  %v2934_v12 = vor.u32 %v3138_v9, %v2931_v11 }
 0x3e1   : > { %1901 = vmatmul.bf16.vlgmr.msra.gmra.mxu1 %v1385_v13  ;;  %1914 = vmatmul.bf16.vlgmr.msra.gmra.mxu2 %v1386_v14  ;;  %v2921_v13 = vld [vmem:[#allocation8 + $0x20] sm:$0xf]  ;;  %v3137_v14 = vld [vmem:[#allocation8 + $0x24] sm:$0xf0]  ;;  %v3136_v15 = vld [vmem:[#allocation8 + $0x24] sm:$0xf] }
 0x3e2   : > { %1927 = vmatmul.bf16.vlgmr.msra.gmra.mxu3 %v3662_v39 }
 0x3e3   : > { %2089 = vmatpush.bf16.msrb.mxu1 %v2934_v12 }
 0x44e   : > { %v1850_v16 = vpop.f32.mrf.mxu1 }
 0x44f   : > { %v1889_v22 = vpop.f32.mrf.mxu0 }
 0x454   : > { %v1863_v23 = vpop.f32.mrf.mxu2 }
 0x455   : > { %v1876_v51 = vpop.f32.mrf.mxu3  ;;  %v1864_v26 = vadd.f32 %v1863_v23, %v1850_v16  ;;  %v2922_v16 = vor.u32 %v3137_v14, %v2921_v13 }
 0x456   : > { %v1852_v25 = vpop.f32.mrf.mxu1 }
 0x457   : > { %v1891_v56 = vpop.f32.mrf.mxu0  ;;  %v1877_v28 = vadd.f32 %v1876_v51, %v1864_v26  ;;  %2077 = vmatpush.bf16.msrb.mxu0 %v2922_v16  ;;  %v2913_v51 = vld [vmem:[#allocation8 + $0x10] sm:$0xf]  ;;  %v3135_v25 = vld [vmem:[#allocation8 + $0x14] sm:$0xf0] }
 0x458   : > { %v3134_v56 = vld [vmem:[#allocation8 + $0x14] sm:$0xf]  ;;  %v2914_v26 = vor.u32 %v3135_v25, %v2913_v51 }
 0x459   : > { %v1890_v31 = vadd.f32 %v1889_v22, %v1877_v28  ;;  %v2923_v22 = vld [vmem:[#allocation8 + $0x28] sm:$0xf0]  ;;  %v2905_v28 = vld [vmem:[#allocation8] sm:$0xf] }
 0x45a   : > { %v2926_v23 = vor.u32 %v3136_v15, %v2923_v22 }
 0x45b   : > { %2078 = vmatpush.bf16.msrb.mxu0 %v2914_v26 }
 0x45c   : > { %v1865_v27 = vpop.f32.mrf.mxu2  ;;  %2090 = vmatpush.bf16.msrb.mxu1 %v2926_v23 }
 0x45d   : > { %v1878_v29 = vpop.f32.mrf.mxu3  ;;  %v2915_v27 = vld [vmem:[#allocation8 + $0x18] sm:$0xf0] }
 0x45e   : > { %v1902_v30 = vpop.f32.mrf.mxu1  ;;  %v3133_v29 = vld [vmem:[#allocation8 + $0x4] sm:$0xf0] }
 0x45f   : > { %v1903_v32 = vadd.f32 %v1902_v30, %v1890_v31  ;;  %v2918_v30 = vor.u32 %v3134_v56, %v2915_v27  ;;  %v3132_v31 = vld [vmem:[#allocation8 + $0x4] sm:$0xf] }
 0x461   : > { %2091 = vmatpush.bf16.msrb.mxu1 %v2918_v30 }
 0x464   : > { %v1915_v33 = vpop.f32.mrf.mxu2 }
 0x465   : > { %v1916_v34 = vadd.f32 %v1915_v33, %v1903_v32  ;;  %v1928_v35 = vpop.f32.mrf.mxu3  ;;  %v2907_v32 = vld [vmem:[#allocation8 + $0x8] sm:$0xf0]  ;;  %v2906_v33 = vor.u32 %v3133_v29, %v2905_v28 }
 0x466   : > { %v1904_v36 = vpop.f32.mrf.mxu1 }
 0x467   : > { %v1929_v37 = vadd.f32 %v1928_v35, %v1916_v34  ;;  %v2910_v34 = vor.u32 %v3132_v31, %v2907_v32  ;;  %2079 = vmatpush.bf16.msrb.mxu0 %v2906_v33 }
 0x469   : > { %1932 = vadd.xlane.f32.xlu2 %v1929_v37  ;;  %2092 = vmatpush.bf16.msrb.mxu1 %v2910_v34 }
 0x46c   : > { %v1917_v39 = vpop.f32.mrf.mxu2 }
 0x46d   : > { %v1930_v38 = vpop.f32.mrf.mxu3 }
 0x4dc   : > { %v1933_v54 = vpop.xlane.xlu2 %1932 }
 0x4dd   : > { %v1941_v55 = vmul.f32 %v3728_v53, %v1933_v54  ;;  %v1989_v54 = vperm.slane %v1986_v52, 1 }
 0x4df   : > { %v3731_v57 = vsub.f32 %v1929_v37, %v1941_v55 }
 0x4e1   : > { %v1943_v58 = vmul.f32 %v3731_v57, %v3731_v57 }
 0x4e3   : > { %1944 = vadd.xlane.f32.xlu0 %v1943_v58 }
 0x556   : > { %v1945_v35 = vpop.xlane.xlu0 %1944 }
 0x557   : > { %v1946_v36 = vmul.f32 %v1945_v35, %v3728_v53  ;;  %v1988_v53 = vperm.slane %v1986_v52, 0 }
 0x559   : > { %v1947_v37 = vadd.f32 1e-05, %v1946_v36 }
 0x55b   : > { %3258 = vrsqrt.f32 %v1947_v37  ;;  %vm1954_vm12 = vweird.f32 %v1947_v37 }
 0x561   : > { %v3259_v39 = vpop.eup %3258 }
 0x562   : > { %v1949_v38 = vmul.f32 %v3259_v39, %v1947_v37  ;;  %vm1955_vm11 = vweird.f32 %v3259_v39 }
 0x563   : > { %vm1956_vm13 = vmor %vm1954_vm12, %vm1955_vm11 }
 0x564   : > { %v1950_v40 = vmul.f32 %v3259_v39, %v1949_v38 }
 0x566   : > { %v1951_v41 = vmul.f32 0.5, %v1950_v40 }
 0x568   : > { %v1952_v42 = vsub.f32 1.5, %v1951_v41 }
 0x56a   : > { %v1953_v19 = vmul.f32 %v3259_v39, %v1952_v42 }
 0x56c   : > { %v1957_v44 = vsel %vm1956_vm13, %v3259_v39, %v1953_v19 }
 0x56d   : > { %v1958_v45 = vmul.f32 %v1957_v44, %v3731_v57 }
 0x56f   : > { %v1963_v48 = vmul.f32 %v3238_v43, %v1958_v45 }
 0x571   : > { %v1968_v49 = vadd.f32 %v3239_v47, %v1963_v48 }
 0x573   : > { %v1969_v50 = vpack.c.bf16 %v1968_v49, %v1968_v49 }
 0x575   : > { %2080 = vmatmul.bf16.vlgmr.msrb.gmra.mxu0 %v1969_v50  ;;  %2093 = vmatmul.bf16.vlgmr.msrb.gmra.mxu1 %v1969_v50 }
 0x5f2   : > { %v2081_v55 = vpop.f32.mrf.mxu0  ;;  %v2094_v57 = vpop.f32.mrf.mxu1 }
 0x5f3   : > { %v2082_v58 = vadd.f32 %v2081_v55, %v1988_v53  ;;  %v2095_v59 = vadd.f32 %v2094_v57, %v1989_v54 }
 0x5f5   : > { %2098 = vst [vmem:[%s418_s20] sm:$0xff] %v2082_v58 }
 0x5f6   : > { %2099 = vst [vmem:[%s418_s20 + $0x8] sm:$0xff] %v2095_v59 }
 0x5f7   : > { %3408 = shalt.err (!%p3405_p8)
}
 0x5f8   : > { %3165 = dma.vmem_to_hbm [thread:$0]  (%p3563_p5), %s2119_s27, 256, %s2121_s29, %s2101_s17  }
 0x5fa   : > { %v2083_v17 = vpop.f32.mrf.mxu0  ;;  %v2096_v60 = vpop.f32.mrf.mxu1 }
 0x5fb PF: > { %s3807_s22 = sld [smem:[#allocation15_spill]]  ;;  %p3192_p9 = scmp.ge.s32.totalorder %s3455_s16, 2 }
 0x5fd   : > { %p3181_p10 = pnand %p3192_p9, %p3567_p6 }
 0x5ff   : > { %p3182_p11 = pneg %p3181_p10 }
 0x601   : > { %s2135_s1 = sand.u32 1, %s3807_s22  }
 0x602   : > { %s2136_s13 = scalar_lea.sflag [#allocation4], %s2135_s1 }
 0x603   : > { %3438 = dma.done.wait (%p3182_p11), %s2136_s13, 256  }
 0x604   : > { %3440 = vsyncadd (%p3182_p11), %s2136_s13, 4294967040  ;;  %s3809_s16 = sld [smem:[#allocation17_spill]]  ;;  %s3812_s13 = smov %s3447_s14 }
 0x605   : > { %s3810_s19 = sld [smem:[#allocation16_spill]] }
 0x606   : > { %s3811_s15 = sld [smem:[#allocation18_spill]] }
 0x60a   : > { %p24_p5 = scmp.ge.s32.totalorder %s3809_s16, 4  }
 0x60b   : > { %s3813_s14 = smov %s3810_s19 }
 0x60c   :  { %26 = sbr.rel (!%p24_p5) target bundleno = 9 (0x9), region = 120 }
 0x611   :  { %2149 = vsyncpa [#allocation3], 1 }
 0x612   :  { %2151 = vsyncpa [#allocation3 + $0x1], 1 }
 0x613   :  { %2152 = vsyncpa [#allocation6], 1 }
 0x614   :  { %2153 = vsyncpa [#allocation9], 1 }
 0x615   :  { %2154 = vsyncpa [#allocation4], 1 }
 0x616   :  { %2156 = vsyncpa [#allocation4 + $0x1], 1 }

</bundles_post_ra>
